<compile_context>
chip_gen: v6e
topology: v6e:2x2x1
jax: 0.10.0
libtpu: 0.0.40
codegen_flags: <defaults>
</compile_context>

<pallas_src>
import functools
import math

import jax
import jax.numpy as jnp
from jax.experimental import pallas as pl
from jax.experimental.pallas import tpu as pltpu

LN_EPS = 1e-5                      # torch.nn.LayerNorm default
MXU_DTYPE = jnp.bfloat16           # set to jnp.float32 for exact f32 parity


def _layernorm(v, w, b):
    mu = jnp.mean(v, axis=-1, keepdims=True)
    var = jnp.mean((v - mu) ** 2, axis=-1, keepdims=True)
    return (v - mu) * jax.lax.rsqrt(var + LN_EPS) * w + b


# ---------------------------------------------------------------------------
# Fused kernel: (x + pos) followed by `layers` ResidualAttentionBlocks.
# Grid = (batch_blocks, layers).  acc_ref (VMEM, f32) carries the activation
# across the layer axis; weights arrive one layer at a time.
# ---------------------------------------------------------------------------
def video_head_kernel(
    x_ref, pos_ref,
    ln1_w, ln1_b, w_qkv, b_qkv, w_out, b_out,
    ln2_w, ln2_b, w_fc, b_fc, w_proj, b_proj,
    o_ref, acc_ref,
    *, n_heads,
):
    l = pl.program_id(1)

    @pl.when(l == 0)
    def _():
        # init carry with x + frame position embeddings (broadcast over batch)
        acc_ref[...] = (x_ref[...].astype(jnp.float32)
                        + pos_ref[...].astype(jnp.float32))

    Bt, T, D = acc_ref.shape
    M = Bt * T
    H = n_heads
    dh = D // H
    mxu = w_qkv.dtype

    x = acc_ref[...].reshape(M, D)                      # (M, D) f32

    # ---- attention branch: x + out_proj(MHA(LN1(x))) ----
    h = _layernorm(x, ln1_w[0], ln1_b[0])
    qkv = jnp.dot(h.astype(mxu), w_qkv[0],
                  preferred_element_type=jnp.float32) + b_qkv[0]     # (M, 3D)
    q = qkv[:, :D].reshape(Bt, T, D)                    # scale already folded in
    k = qkv[:, D:2 * D].reshape(Bt, T, D)
    v = qkv[:, 2 * D:].reshape(Bt, T, D)

    head_outs = []
    for hd in range(H):                                  # static, unrolled
        sl = slice(hd * dh, (hd + 1) * dh)
        qh = q[:, :, sl].astype(mxu)
        kh = k[:, :, sl].astype(mxu)
        vh = v[:, :, sl].astype(mxu)
        s = jnp.einsum("bqd,bkd->bqk", qh, kh,
                       preferred_element_type=jnp.float32)           # (Bt, T, T)
        # softmax (f32); denominator reciprocal on the EUP
        s_max = jnp.max(s, axis=-1, keepdims=True)
        p = jnp.exp(s - s_max)
        p = p * pl.reciprocal(jnp.sum(p, axis=-1, keepdims=True), approx=True)
        head_outs.append(jnp.einsum("bqk,bkd->bqd", p.astype(mxu), vh,
                                    preferred_element_type=jnp.float32))
    attn = jnp.concatenate(head_outs, axis=-1).reshape(M, D)
    attn = jnp.dot(attn.astype(mxu), w_out[0],
                   preferred_element_type=jnp.float32) + b_out[0]
    x = x + attn

    # ---- MLP branch: x + c_proj(QuickGELU(c_fc(LN2(x)))) ----
    h2 = _layernorm(x, ln2_w[0], ln2_b[0])
    m = jnp.dot(h2.astype(mxu), w_fc[0],
                preferred_element_type=jnp.float32) + b_fc[0]
    m = m * jax.nn.sigmoid(1.702 * m)                    # QuickGELU (f32)
    m = jnp.dot(m.astype(mxu), w_proj[0],
                preferred_element_type=jnp.float32) + b_proj[0]
    x = x + m

    acc_ref[...] = x.reshape(Bt, T, D)

    @pl.when(l == pl.num_programs(1) - 1)
    def _():
        o_ref[...] = acc_ref[...].astype(o_ref.dtype)


def _pick_batch_block(B, T, D, per_layer_w_bytes,
                      target_rows=256, vmem_budget=40 << 20):
    """Largest divisor Bt of B with Bt*T <= target_rows and an estimated
    per-tile VMEM working set (f32 intermediates + double-buffered per-layer
    weights) within budget.  Always >= 1."""
    bt = 1
    for d in range(1, B + 1):
        if B % d != 0:
            continue
        M = d * T
        if M > target_rows:
            break
        act_f32 = M * D * 4
        # acc + x + h + qkv(3D) + attn + mlp(4D)*2 + bf16 copies (~3D)
        working = act_f32 * 18
        if 4 * per_layer_w_bytes + working <= vmem_budget:
            bt = d
    return bt


# ---------------------------------------------------------------------------
# VideoHead.forward
# ---------------------------------------------------------------------------
def video_head_forward(img_embs, params, n_frames, n_heads):
    N, D = img_embs.shape
    T = n_frames
    B = N // T
    x = img_embs.reshape(B, T, D)                        # (B, T, D) glue reshape

    weight_names = ("ln1_w", "ln1_b", "w_qkv", "b_qkv", "w_out", "b_out",
                    "ln2_w", "ln2_b", "w_fc", "b_fc", "w_proj", "b_proj")
    weights = [params[n] for n in weight_names]
    L = weights[0].shape[0]

    weight_bytes = sum(int(w.size) * w.dtype.itemsize for w in weights)
    per_layer_w = weight_bytes // L

    Bt = _pick_batch_block(B, T, D, per_layer_w)
    nb = B // Bt

    def wspec(arr):
        return pl.BlockSpec((1,) + arr.shape[1:], lambda b, l: (l, 0, 0))

    # advisory cost estimate: 12*D^2 MACs/token/layer in the dense matmuls,
    # plus QK^T / PV attention matmuls; exp + sigmoid transcendentals.
    flops = int(L * (2 * B * T * 12 * D * D + 4 * B * T * T * D))
    transcendentals = int(L * (B * n_heads * T * T + B * T * 4 * D))
    bytes_accessed = int(2 * B * T * D * 4 + T * D * 4 + weight_bytes)

    # VMEM budget: per-layer weights are double-buffered; only raise the
    # scoped limit if the default 32 MiB would not be enough (v7x has 64 MiB).
    act_bytes = Bt * T * D * 4
    vmem_needed = 4 * per_layer_w + 18 * act_bytes + (2 << 20)
    vmem_limit = int(min(vmem_needed, 64 << 20)) if vmem_needed > (32 << 20) else None

    kernel = functools.partial(video_head_kernel, n_heads=n_heads)

    return pl.pallas_call(
        kernel,
        out_shape=jax.ShapeDtypeStruct((B, T, D), x.dtype),
        grid=(nb, L),
        in_specs=[pl.BlockSpec((Bt, T, D), lambda b, l: (b, 0, 0)),
                  pl.BlockSpec((T, D), lambda b, l: (0, 0))]
                 + [wspec(w) for w in weights],
        out_specs=pl.BlockSpec((Bt, T, D), lambda b, l: (b, 0, 0)),
        scratch_shapes=[pltpu.VMEM((Bt, T, D), jnp.float32)],
        compiler_params=pltpu.CompilerParams(
            dimension_semantics=("parallel", "arbitrary"),
            vmem_limit_bytes=vmem_limit),
        cost_estimate=pl.CostEstimate(flops=flops,
                                      transcendentals=transcendentals,
                                      bytes_accessed=bytes_accessed),
    )(x, params["pos_emb"], *weights)


# ---------------------------------------------------------------------------
# Parameter init (mirrors the PyTorch module's init scheme):
#   - nn.Embedding:            N(0, 1)
#   - MHA in_proj_weight:      xavier_uniform, bias 0
#   - all nn.Linear weights:   trunc_normal(std=0.02), bias 0
#   - LayerNorm:               weight 1, bias 0
# Weights are stored stacked over layers, pre-transposed to (in, out) and
# (except biases / LN params) cast to MXU_DTYPE.  1/sqrt(dh) is folded into
# the Q columns of the in-projection.
# ---------------------------------------------------------------------------
def init_params(key, emb_dim, layers, n_frames, n_heads, weight_dtype=MXU_DTYPE):
    D = emb_dim
    dh = D // n_heads
    scale = 1.0 / math.sqrt(dh)
    keys = jax.random.split(key, 1 + layers)
    pos_emb = jax.random.normal(keys[0], (n_frames, D), jnp.float32)

    def trunc(k, shape, std=0.02):
        return std * jax.random.truncated_normal(k, -2.0, 2.0, shape, jnp.float32)

    col_scale = jnp.concatenate([jnp.full((D,), scale, jnp.float32),
                                 jnp.ones((2 * D,), jnp.float32)])

    w_qkv_l, w_out_l, w_fc_l, w_proj_l = [], [], [], []
    for i in range(layers):
        lk = jax.random.split(keys[1 + i], 4)
        xav = math.sqrt(6.0 / (D + 3 * D))
        w_qkv = jax.random.uniform(lk[0], (3 * D, D), jnp.float32, -xav, xav)
        w_out = trunc(lk[1], (D, D))
        w_fc = trunc(lk[2], (4 * D, D))
        w_proj = trunc(lk[3], (D, 4 * D))
        w_qkv_l.append(jnp.transpose(w_qkv) * col_scale[None, :])   # fold attn scale
        w_out_l.append(jnp.transpose(w_out))
        w_fc_l.append(jnp.transpose(w_fc))
        w_proj_l.append(jnp.transpose(w_proj))

    return {
        "pos_emb": pos_emb,
        "ln1_w": jnp.ones((layers, 1, D), jnp.float32),
        "ln1_b": jnp.zeros((layers, 1, D), jnp.float32),
        "w_qkv": jnp.stack(w_qkv_l).astype(weight_dtype),
        "b_qkv": jnp.zeros((layers, 1, 3 * D), jnp.float32),
        "w_out": jnp.stack(w_out_l).astype(weight_dtype),
        "b_out": jnp.zeros((layers, 1, D), jnp.float32),
        "ln2_w": jnp.ones((layers, 1, D), jnp.float32),
        "ln2_b": jnp.zeros((layers, 1, D), jnp.float32),
        "w_fc": jnp.stack(w_fc_l).astype(weight_dtype),
        "b_fc": jnp.zeros((layers, 1, 4 * D), jnp.float32),
        "w_proj": jnp.stack(w_proj_l).astype(weight_dtype),
        "b_proj": jnp.zeros((layers, 1, D), jnp.float32),
    }


if __name__ == "__main__":
    emb_dim, layers, n_frames = 128, 2, 8
    n_heads = emb_dim // 64                              # as in VideoHead.__init__
    B = 2

    key = jax.random.PRNGKey(0)
    k_in, k_p = jax.random.split(key)
    img_embs = jax.random.normal(k_in, (B * n_frames, emb_dim), jnp.float32)
    params = init_params(k_p, emb_dim, layers, n_frames, n_heads)

    out = video_head_forward(img_embs, params, n_frames, n_heads)
    out = jax.block_until_ready(out)
    assert out.shape == (B, n_frames, emb_dim)
    assert bool(jnp.all(jnp.isfinite(out)))
    print("KERNEL_OK")
</pallas_src>

<mosaic_0001>
module attributes {stable_mosaic.version = 11 : i64} {
  func.func @video_head_kernel(%arg0: i32, %arg1: i32, %arg2: memref<2x8x128xf32, #tpu.memory_space<vmem>>, %arg3: memref<8x128xf32, #tpu.memory_space<vmem>>, %arg4: memref<1x1x128xf32, #tpu.memory_space<vmem>>, %arg5: memref<1x1x128xf32, #tpu.memory_space<vmem>>, %arg6: memref<1x128x384xbf16, #tpu.memory_space<vmem>>, %arg7: memref<1x1x384xf32, #tpu.memory_space<vmem>>, %arg8: memref<1x128x128xbf16, #tpu.memory_space<vmem>>, %arg9: memref<1x1x128xf32, #tpu.memory_space<vmem>>, %arg10: memref<1x1x128xf32, #tpu.memory_space<vmem>>, %arg11: memref<1x1x128xf32, #tpu.memory_space<vmem>>, %arg12: memref<1x128x512xbf16, #tpu.memory_space<vmem>>, %arg13: memref<1x1x512xf32, #tpu.memory_space<vmem>>, %arg14: memref<1x512x128xbf16, #tpu.memory_space<vmem>>, %arg15: memref<1x1x128xf32, #tpu.memory_space<vmem>>, %arg16: memref<2x8x128xf32, #tpu.memory_space<vmem>>, %arg17: memref<2x8x128xf32, #tpu.memory_space<vmem>>) attributes {dimension_semantics = [#tpu.dimension_semantics<parallel>, #tpu.dimension_semantics<arbitrary>], iteration_bounds = array<i64: 1, 2>, scalar_prefetch = 0 : i64, scratch_operands = 1 : i64, tpu.core_type = #tpu.core_type<tc>, window_params = [{transform_indices = @transform_0, window_bounds = array<i64: 2, 8, 128>}, {pipeline_mode = #tpu.pipeline_mode<synchronous>, transform_indices = @transform_1, window_bounds = array<i64: 8, 128>}, {transform_indices = @transform_2, window_bounds = array<i64: 1, 1, 128>}, {transform_indices = @transform_3, window_bounds = array<i64: 1, 1, 128>}, {transform_indices = @transform_4, window_bounds = array<i64: 1, 128, 384>}, {transform_indices = @transform_5, window_bounds = array<i64: 1, 1, 384>}, {transform_indices = @transform_6, window_bounds = array<i64: 1, 128, 128>}, {transform_indices = @transform_7, window_bounds = array<i64: 1, 1, 128>}, {transform_indices = @transform_8, window_bounds = array<i64: 1, 1, 128>}, {transform_indices = @transform_9, window_bounds = array<i64: 1, 1, 128>}, {transform_indices = @transform_10, window_bounds = array<i64: 1, 128, 512>}, {transform_indices = @transform_11, window_bounds = array<i64: 1, 1, 512>}, {transform_indices = @transform_12, window_bounds = array<i64: 1, 512, 128>}, {transform_indices = @transform_13, window_bounds = array<i64: 1, 1, 128>}, {transform_indices = @transform_14, window_bounds = array<i64: 2, 8, 128>}]} {
    %c0_i32 = arith.constant 0 : i32
    %0 = arith.cmpi eq, %arg1, %c0_i32 : i32
    %1 = arith.extui %0 : i1 to i32
    %c0_i32_0 = arith.constant 0 : i32
    %2 = arith.cmpi ne, %1, %c0_i32_0 : i32
    scf.if %2 {
      %c0_66 = arith.constant 0 : index
      %c0_67 = arith.constant 0 : index
      %c0_68 = arith.constant 0 : index
      %150 = vector.load %arg2[%c0_66, %c0_67, %c0_68] : memref<2x8x128xf32, #tpu.memory_space<vmem>>, vector<2x8x128xf32>
      %c0_69 = arith.constant 0 : index
      %c0_70 = arith.constant 0 : index
      %151 = vector.load %arg3[%c0_69, %c0_70] : memref<8x128xf32, #tpu.memory_space<vmem>>, vector<8x128xf32>
      %152 = vector.shape_cast %151 : vector<8x128xf32> to vector<1x8x128xf32>
      %153 = vector.broadcast %152 : vector<1x8x128xf32> to vector<2x8x128xf32>
      %154 = arith.addf %150, %153 : vector<2x8x128xf32>
      %c0_71 = arith.constant 0 : index
      %c0_72 = arith.constant 0 : index
      %c0_73 = arith.constant 0 : index
      %155 = vector.load %arg17[%c0_71, %c0_72, %c0_73] : memref<2x8x128xf32, #tpu.memory_space<vmem>>, vector<2x8x128xf32>
      tpu.vector_store %arg17[%c0_71, %c0_72, %c0_73], %154 {strides = array<i32>} : memref<2x8x128xf32, #tpu.memory_space<vmem>>, vector<2x8x128xf32>,
    } else {
    }
    %c0 = arith.constant 0 : index
    %c0_1 = arith.constant 0 : index
    %c0_2 = arith.constant 0 : index
    %3 = vector.load %arg17[%c0, %c0_1, %c0_2] : memref<2x8x128xf32, #tpu.memory_space<vmem>>, vector<2x8x128xf32>
    %4 = vector.shape_cast %3 : vector<2x8x128xf32> to vector<16x128xf32>
    %c0_3 = arith.constant 0 : index
    %c0_4 = arith.constant 0 : index
    %c0_5 = arith.constant 0 : index
    %5 = vector.load %arg4[%c0_3, %c0_4, %c0_5] : memref<1x1x128xf32, #tpu.memory_space<vmem>>, vector<1x1x128xf32>
    %6 = vector.shape_cast %5 : vector<1x1x128xf32> to vector<1x128xf32>
    %c0_6 = arith.constant 0 : index
    %c0_7 = arith.constant 0 : index
    %c0_8 = arith.constant 0 : index
    %7 = vector.load %arg5[%c0_6, %c0_7, %c0_8] : memref<1x1x128xf32, #tpu.memory_space<vmem>>, vector<1x1x128xf32>
    %8 = vector.shape_cast %7 : vector<1x1x128xf32> to vector<1x128xf32>
    %cst = arith.constant dense<0.000000e+00> : vector<16xf32>
    %9 = vector.multi_reduction <add>, %4, %cst [1] : vector<16x128xf32> to vector<16xf32>
    %10 = vector.shape_cast %9 : vector<16xf32> to vector<16x1xf32>
    %cst_9 = arith.constant 1.280000e+02 : f32
    %11 = vector.broadcast %cst_9 : f32 to vector<16x1xf32>
    %12 = arith.divf %10, %11 : vector<16x1xf32>
    %13 = vector.broadcast %12 : vector<16x1xf32> to vector<16x128xf32>
    %14 = arith.subf %4, %13 : vector<16x128xf32>
    %15 = arith.mulf %14, %14 : vector<16x128xf32>
    %cst_10 = arith.constant dense<0.000000e+00> : vector<16xf32>
    %16 = vector.multi_reduction <add>, %15, %cst_10 [1] : vector<16x128xf32> to vector<16xf32>
    %17 = vector.shape_cast %16 : vector<16xf32> to vector<16x1xf32>
    %cst_11 = arith.constant 1.280000e+02 : f32
    %18 = vector.broadcast %cst_11 : f32 to vector<16x1xf32>
    %19 = arith.divf %17, %18 : vector<16x1xf32>
    %20 = vector.broadcast %12 : vector<16x1xf32> to vector<16x128xf32>
    %21 = arith.subf %4, %20 : vector<16x128xf32>
    %cst_12 = arith.constant 9.99999974E-6 : f32
    %22 = vector.broadcast %cst_12 : f32 to vector<16x1xf32>
    %23 = arith.addf %19, %22 : vector<16x1xf32>
    %24 = math.rsqrt %23 : vector<16x1xf32>
    %25 = vector.broadcast %24 : vector<16x1xf32> to vector<16x128xf32>
    %26 = arith.mulf %21, %25 : vector<16x128xf32>
    %27 = vector.broadcast %6 : vector<1x128xf32> to vector<16x128xf32>
    %28 = arith.mulf %26, %27 : vector<16x128xf32>
    %29 = vector.broadcast %8 : vector<1x128xf32> to vector<16x128xf32>
    %30 = arith.addf %28, %29 : vector<16x128xf32>
    %31 = arith.truncf %30 : vector<16x128xf32> to vector<16x128xbf16>
    %c0_13 = arith.constant 0 : index
    %c0_14 = arith.constant 0 : index
    %c0_15 = arith.constant 0 : index
    %32 = vector.load %arg6[%c0_13, %c0_14, %c0_15] : memref<1x128x384xbf16, #tpu.memory_space<vmem>>, vector<1x128x384xbf16>
    %33 = vector.shape_cast %32 : vector<1x128x384xbf16> to vector<128x384xbf16>
    %cst_16 = arith.constant dense<0.000000e+00> : vector<16x384xf32>
    %34 = tpu.matmul %31, %33, %cst_16 {dimension_numbers = #tpu.dot_dimension_numbers<[1], [0], [0], [1], [0, 0, 1, 1], [], []>} : vector<16x128xbf16>, vector<128x384xbf16>, vector<16x384xf32> -> vector<16x384xf32>
    %c0_17 = arith.constant 0 : index
    %c0_18 = arith.constant 0 : index
    %c0_19 = arith.constant 0 : index
    %35 = vector.load %arg7[%c0_17, %c0_18, %c0_19] : memref<1x1x384xf32, #tpu.memory_space<vmem>>, vector<1x1x384xf32>
    %36 = vector.shape_cast %35 : vector<1x1x384xf32> to vector<1x384xf32>
    %37 = vector.broadcast %36 : vector<1x384xf32> to vector<16x384xf32>
    %38 = arith.addf %34, %37 : vector<16x384xf32>
    %39 = vector.extract_strided_slice %38 {offsets = [0, 0], sizes = [16, 128], strides = [1, 1]} : vector<16x384xf32> to vector<16x128xf32>
    %40 = vector.shape_cast %39 : vector<16x128xf32> to vector<2x8x128xf32>
    %41 = vector.extract_strided_slice %38 {offsets = [0, 128], sizes = [16, 128], strides = [1, 1]} : vector<16x384xf32> to vector<16x128xf32>
    %42 = vector.shape_cast %41 : vector<16x128xf32> to vector<2x8x128xf32>
    %43 = vector.extract_strided_slice %38 {offsets = [0, 256], sizes = [16, 128], strides = [1, 1]} : vector<16x384xf32> to vector<16x128xf32>
    %44 = vector.shape_cast %43 : vector<16x128xf32> to vector<2x8x128xf32>
    %45 = vector.extract_strided_slice %40 {offsets = [0, 0, 0], sizes = [2, 8, 64], strides = [1, 1, 1]} : vector<2x8x128xf32> to vector<2x8x64xf32>
    %46 = arith.truncf %45 : vector<2x8x64xf32> to vector<2x8x64xbf16>
    %47 = vector.extract_strided_slice %42 {offsets = [0, 0, 0], sizes = [2, 8, 64], strides = [1, 1, 1]} : vector<2x8x128xf32> to vector<2x8x64xf32>
    %48 = arith.truncf %47 : vector<2x8x64xf32> to vector<2x8x64xbf16>
    %49 = vector.extract_strided_slice %44 {offsets = [0, 0, 0], sizes = [2, 8, 64], strides = [1, 1, 1]} : vector<2x8x128xf32> to vector<2x8x64xf32>
    %50 = arith.truncf %49 : vector<2x8x64xf32> to vector<2x8x64xbf16>
    "tpu.trace_start"() <{level = 10 : i32, message = "bqd,bkd->bqk"}> : () -> ()
    %cst_20 = arith.constant dense<0.000000e+00> : vector<2x8x8xf32>
    %51 = tpu.matmul %46, %48, %cst_20 {dimension_numbers = #tpu.dot_dimension_numbers<[2], [2], [1], [1], [0, 0, 0, 1, 1, 1], [0], [0]>} : vector<2x8x64xbf16>, vector<2x8x64xbf16>, vector<2x8x8xf32> -> vector<2x8x8xf32>
    "tpu.trace_stop"() : () -> ()
    %cst_21 = arith.constant dense<0xFF800000> : vector<2x8xf32>
    %52 = vector.multi_reduction <maximumf>, %51, %cst_21 [2] : vector<2x8x8xf32> to vector<2x8xf32>
    %53 = vector.shape_cast %52 : vector<2x8xf32> to vector<2x8x1xf32>
    %54 = vector.broadcast %53 : vector<2x8x1xf32> to vector<2x8x8xf32>
    %55 = arith.subf %51, %54 : vector<2x8x8xf32>
    %56 = math.exp %55 : vector<2x8x8xf32>
    %cst_22 = arith.constant dense<0.000000e+00> : vector<2x8xf32>
    %57 = vector.multi_reduction <add>, %56, %cst_22 [2] : vector<2x8x8xf32> to vector<2x8xf32>
    %58 = vector.shape_cast %57 : vector<2x8xf32> to vector<2x8x1xf32>
    %59 = tpu.reciprocal %58 {approx = true} : vector<2x8x1xf32> -> vector<2x8x1xf32>
    %60 = vector.broadcast %59 : vector<2x8x1xf32> to vector<2x8x8xf32>
    %61 = arith.mulf %56, %60 : vector<2x8x8xf32>
    %62 = arith.truncf %61 : vector<2x8x8xf32> to vector<2x8x8xbf16>
    "tpu.trace_start"() <{level = 10 : i32, message = "bqk,bkd->bqd"}> : () -> ()
    %cst_23 = arith.constant dense<0.000000e+00> : vector<2x8x64xf32>
    %63 = tpu.matmul %62, %50, %cst_23 {dimension_numbers = #tpu.dot_dimension_numbers<[2], [1], [1], [2], [0, 0, 0, 1, 1, 2], [0], [0]>} : vector<2x8x8xbf16>, vector<2x8x64xbf16>, vector<2x8x64xf32> -> vector<2x8x64xf32>
    "tpu.trace_stop"() : () -> ()
    %64 = vector.extract_strided_slice %40 {offsets = [0, 0, 64], sizes = [2, 8, 64], strides = [1, 1, 1]} : vector<2x8x128xf32> to vector<2x8x64xf32>
    %65 = arith.truncf %64 : vector<2x8x64xf32> to vector<2x8x64xbf16>
    %66 = vector.extract_strided_slice %42 {offsets = [0, 0, 64], sizes = [2, 8, 64], strides = [1, 1, 1]} : vector<2x8x128xf32> to vector<2x8x64xf32>
    %67 = arith.truncf %66 : vector<2x8x64xf32> to vector<2x8x64xbf16>
    %68 = vector.extract_strided_slice %44 {offsets = [0, 0, 64], sizes = [2, 8, 64], strides = [1, 1, 1]} : vector<2x8x128xf32> to vector<2x8x64xf32>
    %69 = arith.truncf %68 : vector<2x8x64xf32> to vector<2x8x64xbf16>
    "tpu.trace_start"() <{level = 10 : i32, message = "bqd,bkd->bqk"}> : () -> ()
    %cst_24 = arith.constant dense<0.000000e+00> : vector<2x8x8xf32>
    %70 = tpu.matmul %65, %67, %cst_24 {dimension_numbers = #tpu.dot_dimension_numbers<[2], [2], [1], [1], [0, 0, 0, 1, 1, 1], [0], [0]>} : vector<2x8x64xbf16>, vector<2x8x64xbf16>, vector<2x8x8xf32> -> vector<2x8x8xf32>
    "tpu.trace_stop"() : () -> ()
    %cst_25 = arith.constant dense<0xFF800000> : vector<2x8xf32>
    %71 = vector.multi_reduction <maximumf>, %70, %cst_25 [2] : vector<2x8x8xf32> to vector<2x8xf32>
    %72 = vector.shape_cast %71 : vector<2x8xf32> to vector<2x8x1xf32>
    %73 = vector.broadcast %72 : vector<2x8x1xf32> to vector<2x8x8xf32>
    %74 = arith.subf %70, %73 : vector<2x8x8xf32>
    %75 = math.exp %74 : vector<2x8x8xf32>
    %cst_26 = arith.constant dense<0.000000e+00> : vector<2x8xf32>
    %76 = vector.multi_reduction <add>, %75, %cst_26 [2] : vector<2x8x8xf32> to vector<2x8xf32>
    %77 = vector.shape_cast %76 : vector<2x8xf32> to vector<2x8x1xf32>
    %78 = tpu.reciprocal %77 {approx = true} : vector<2x8x1xf32> -> vector<2x8x1xf32>
    %79 = vector.broadcast %78 : vector<2x8x1xf32> to vector<2x8x8xf32>
    %80 = arith.mulf %75, %79 : vector<2x8x8xf32>
    %81 = arith.truncf %80 : vector<2x8x8xf32> to vector<2x8x8xbf16>
    "tpu.trace_start"() <{level = 10 : i32, message = "bqk,bkd->bqd"}> : () -> ()
    %cst_27 = arith.constant dense<0.000000e+00> : vector<2x8x64xf32>
    %82 = tpu.matmul %81, %69, %cst_27 {dimension_numbers = #tpu.dot_dimension_numbers<[2], [1], [1], [2], [0, 0, 0, 1, 1, 2], [0], [0]>} : vector<2x8x8xbf16>, vector<2x8x64xbf16>, vector<2x8x64xf32> -> vector<2x8x64xf32>
    "tpu.trace_stop"() : () -> ()
    %83 = tpu.concatenate %63, %82 in 2 : vector<2x8x64xf32>, vector<2x8x64xf32> -> vector<2x8x128xf32>
    %84 = vector.shape_cast %83 : vector<2x8x128xf32> to vector<16x128xf32>
    %85 = arith.truncf %84 : vector<16x128xf32> to vector<16x128xbf16>
    %c0_28 = arith.constant 0 : index
    %c0_29 = arith.constant 0 : index
    %c0_30 = arith.constant 0 : index
    %86 = vector.load %arg8[%c0_28, %c0_29, %c0_30] : memref<1x128x128xbf16, #tpu.memory_space<vmem>>, vector<1x128x128xbf16>
    %87 = vector.shape_cast %86 : vector<1x128x128xbf16> to vector<128x128xbf16>
    %cst_31 = arith.constant dense<0.000000e+00> : vector<16x128xf32>
    %88 = tpu.matmul %85, %87, %cst_31 {dimension_numbers = #tpu.dot_dimension_numbers<[1], [0], [0], [1], [0, 0, 1, 1], [], []>} : vector<16x128xbf16>, vector<128x128xbf16>, vector<16x128xf32> -> vector<16x128xf32>
    %c0_32 = arith.constant 0 : index
    %c0_33 = arith.constant 0 : index
    %c0_34 = arith.constant 0 : index
    %89 = vector.load %arg9[%c0_32, %c0_33, %c0_34] : memref<1x1x128xf32, #tpu.memory_space<vmem>>, vector<1x1x128xf32>
    %90 = vector.shape_cast %89 : vector<1x1x128xf32> to vector<1x128xf32>
    %91 = vector.broadcast %90 : vector<1x128xf32> to vector<16x128xf32>
    %92 = arith.addf %88, %91 : vector<16x128xf32>
    %93 = arith.addf %4, %92 : vector<16x128xf32>
    %c0_35 = arith.constant 0 : index
    %c0_36 = arith.constant 0 : index
    %c0_37 = arith.constant 0 : index
    %94 = vector.load %arg10[%c0_35, %c0_36, %c0_37] : memref<1x1x128xf32, #tpu.memory_space<vmem>>, vector<1x1x128xf32>
    %95 = vector.shape_cast %94 : vector<1x1x128xf32> to vector<1x128xf32>
    %c0_38 = arith.constant 0 : index
    %c0_39 = arith.constant 0 : index
    %c0_40 = arith.constant 0 : index
    %96 = vector.load %arg11[%c0_38, %c0_39, %c0_40] : memref<1x1x128xf32, #tpu.memory_space<vmem>>, vector<1x1x128xf32>
    %97 = vector.shape_cast %96 : vector<1x1x128xf32> to vector<1x128xf32>
    %cst_41 = arith.constant dense<0.000000e+00> : vector<16xf32>
    %98 = vector.multi_reduction <add>, %93, %cst_41 [1] : vector<16x128xf32> to vector<16xf32>
    %99 = vector.shape_cast %98 : vector<16xf32> to vector<16x1xf32>
    %cst_42 = arith.constant 1.280000e+02 : f32
    %100 = vector.broadcast %cst_42 : f32 to vector<16x1xf32>
    %101 = arith.divf %99, %100 : vector<16x1xf32>
    %102 = vector.broadcast %101 : vector<16x1xf32> to vector<16x128xf32>
    %103 = arith.subf %93, %102 : vector<16x128xf32>
    %104 = arith.mulf %103, %103 : vector<16x128xf32>
    %cst_43 = arith.constant dense<0.000000e+00> : vector<16xf32>
    %105 = vector.multi_reduction <add>, %104, %cst_43 [1] : vector<16x128xf32> to vector<16xf32>
    %106 = vector.shape_cast %105 : vector<16xf32> to vector<16x1xf32>
    %cst_44 = arith.constant 1.280000e+02 : f32
    %107 = vector.broadcast %cst_44 : f32 to vector<16x1xf32>
    %108 = arith.divf %106, %107 : vector<16x1xf32>
    %109 = vector.broadcast %101 : vector<16x1xf32> to vector<16x128xf32>
    %110 = arith.subf %93, %109 : vector<16x128xf32>
    %cst_45 = arith.constant 9.99999974E-6 : f32
    %111 = vector.broadcast %cst_45 : f32 to vector<16x1xf32>
    %112 = arith.addf %108, %111 : vector<16x1xf32>
    %113 = math.rsqrt %112 : vector<16x1xf32>
    %114 = vector.broadcast %113 : vector<16x1xf32> to vector<16x128xf32>
    %115 = arith.mulf %110, %114 : vector<16x128xf32>
    %116 = vector.broadcast %95 : vector<1x128xf32> to vector<16x128xf32>
    %117 = arith.mulf %115, %116 : vector<16x128xf32>
    %118 = vector.broadcast %97 : vector<1x128xf32> to vector<16x128xf32>
    %119 = arith.addf %117, %118 : vector<16x128xf32>
    %120 = arith.truncf %119 : vector<16x128xf32> to vector<16x128xbf16>
    %c0_46 = arith.constant 0 : index
    %c0_47 = arith.constant 0 : index
    %c0_48 = arith.constant 0 : index
    %121 = vector.load %arg12[%c0_46, %c0_47, %c0_48] : memref<1x128x512xbf16, #tpu.memory_space<vmem>>, vector<1x128x512xbf16>
    %122 = vector.shape_cast %121 : vector<1x128x512xbf16> to vector<128x512xbf16>
    %cst_49 = arith.constant dense<0.000000e+00> : vector<16x512xf32>
    %123 = tpu.matmul %120, %122, %cst_49 {dimension_numbers = #tpu.dot_dimension_numbers<[1], [0], [0], [1], [0, 0, 1, 1], [], []>} : vector<16x128xbf16>, vector<128x512xbf16>, vector<16x512xf32> -> vector<16x512xf32>
    %c0_50 = arith.constant 0 : index
    %c0_51 = arith.constant 0 : index
    %c0_52 = arith.constant 0 : index
    %124 = vector.load %arg13[%c0_50, %c0_51, %c0_52] : memref<1x1x512xf32, #tpu.memory_space<vmem>>, vector<1x1x512xf32>
    %125 = vector.shape_cast %124 : vector<1x1x512xf32> to vector<1x512xf32>
    %126 = vector.broadcast %125 : vector<1x512xf32> to vector<16x512xf32>
    %127 = arith.addf %123, %126 : vector<16x512xf32>
    %cst_53 = arith.constant 1.702000e+00 : f32
    %128 = vector.broadcast %cst_53 : f32 to vector<16x512xf32>
    %129 = arith.mulf %128, %127 : vector<16x512xf32>
    %130 = arith.negf %129 : vector<16x512xf32>
    %131 = math.exp %130 : vector<16x512xf32>
    %cst_54 = arith.constant 1.000000e+00 : f32
    %132 = vector.broadcast %cst_54 : f32 to vector<16x512xf32>
    %133 = arith.addf %132, %131 : vector<16x512xf32>
    %134 = arith.divf %132, %133 : vector<16x512xf32>
    %135 = arith.mulf %127, %134 : vector<16x512xf32>
    %136 = arith.truncf %135 : vector<16x512xf32> to vector<16x512xbf16>
    %c0_55 = arith.constant 0 : index
    %c0_56 = arith.constant 0 : index
    %c0_57 = arith.constant 0 : index
    %137 = vector.load %arg14[%c0_55, %c0_56, %c0_57] : memref<1x512x128xbf16, #tpu.memory_space<vmem>>, vector<1x512x128xbf16>
    %138 = vector.shape_cast %137 : vector<1x512x128xbf16> to vector<512x128xbf16>
    %cst_58 = arith.constant dense<0.000000e+00> : vector<16x128xf32>
    %139 = tpu.matmul %136, %138, %cst_58 {dimension_numbers = #tpu.dot_dimension_numbers<[1], [0], [0], [1], [0, 0, 1, 1], [], []>} : vector<16x512xbf16>, vector<512x128xbf16>, vector<16x128xf32> -> vector<16x128xf32>
    %c0_59 = arith.constant 0 : index
    %c0_60 = arith.constant 0 : index
    %c0_61 = arith.constant 0 : index
    %140 = vector.load %arg15[%c0_59, %c0_60, %c0_61] : memref<1x1x128xf32, #tpu.memory_space<vmem>>, vector<1x1x128xf32>
    %141 = vector.shape_cast %140 : vector<1x1x128xf32> to vector<1x128xf32>
    %142 = vector.broadcast %141 : vector<1x128xf32> to vector<16x128xf32>
    %143 = arith.addf %139, %142 : vector<16x128xf32>
    %144 = arith.addf %93, %143 : vector<16x128xf32>
    %145 = vector.shape_cast %144 : vector<16x128xf32> to vector<2x8x128xf32>
    %c0_62 = arith.constant 0 : index
    %c0_63 = arith.constant 0 : index
    %c0_64 = arith.constant 0 : index
    %146 = vector.load %arg17[%c0_62, %c0_63, %c0_64] : memref<2x8x128xf32, #tpu.memory_space<vmem>>, vector<2x8x128xf32>
    tpu.vector_store %arg17[%c0_62, %c0_63, %c0_64], %145 {strides = array<i32>} : memref<2x8x128xf32, #tpu.memory_space<vmem>>, vector<2x8x128xf32>,
    %c1_i32 = arith.constant 1 : i32
    %147 = arith.cmpi eq, %arg1, %c1_i32 : i32
    %148 = arith.extui %147 : i1 to i32
    %c0_i32_65 = arith.constant 0 : i32
    %149 = arith.cmpi ne, %148, %c0_i32_65 : i32
    scf.if %149 {
      %c0_66 = arith.constant 0 : index
      %c0_67 = arith.constant 0 : index
      %c0_68 = arith.constant 0 : index
      %150 = vector.load %arg17[%c0_66, %c0_67, %c0_68] : memref<2x8x128xf32, #tpu.memory_space<vmem>>, vector<2x8x128xf32>
      %c0_69 = arith.constant 0 : index
      %c0_70 = arith.constant 0 : index
      %c0_71 = arith.constant 0 : index
      %151 = vector.load %arg16[%c0_69, %c0_70, %c0_71] : memref<2x8x128xf32, #tpu.memory_space<vmem>>, vector<2x8x128xf32>
      tpu.vector_store %arg16[%c0_69, %c0_70, %c0_71], %150 {strides = array<i32>} : memref<2x8x128xf32, #tpu.memory_space<vmem>>, vector<2x8x128xf32>,
    } else {
    }
    return
  }
  func.func @transform_0(%arg0: i32, %arg1: i32) -> (i32, i32, i32) {
    %c0_i32 = arith.constant 0 : i32
    %c0_i32_0 = arith.constant 0 : i32
    %c0_i32_1 = arith.constant 0 : i32
    return %arg0, %c0_i32, %c0_i32_0 : i32, i32, i32
  }
  func.func @transform_1(%arg0: i32, %arg1: i32) -> (i32, i32) {
    %c0_i32 = arith.constant 0 : i32
    %c0_i32_0 = arith.constant 0 : i32
    %c0_i32_1 = arith.constant 0 : i32
    return %c0_i32, %c0_i32_0 : i32, i32
  }
  func.func @transform_2(%arg0: i32, %arg1: i32) -> (i32, i32, i32) {
    %c0_i32 = arith.constant 0 : i32
    %c0_i32_0 = arith.constant 0 : i32
    %c0_i32_1 = arith.constant 0 : i32
    return %arg1, %c0_i32, %c0_i32_0 : i32, i32, i32
  }
  func.func @transform_3(%arg0: i32, %arg1: i32) -> (i32, i32, i32) {
    %c0_i32 = arith.constant 0 : i32
    %c0_i32_0 = arith.constant 0 : i32
    %c0_i32_1 = arith.constant 0 : i32
    return %arg1, %c0_i32, %c0_i32_0 : i32, i32, i32
  }
  func.func @transform_4(%arg0: i32, %arg1: i32) -> (i32, i32, i32) {
    %c0_i32 = arith.constant 0 : i32
    %c0_i32_0 = arith.constant 0 : i32
    %c0_i32_1 = arith.constant 0 : i32
    return %arg1, %c0_i32, %c0_i32_0 : i32, i32, i32
  }
  func.func @transform_5(%arg0: i32, %arg1: i32) -> (i32, i32, i32) {
    %c0_i32 = arith.constant 0 : i32
    %c0_i32_0 = arith.constant 0 : i32
    %c0_i32_1 = arith.constant 0 : i32
    return %arg1, %c0_i32, %c0_i32_0 : i32, i32, i32
  }
  func.func @transform_6(%arg0: i32, %arg1: i32) -> (i32, i32, i32) {
    %c0_i32 = arith.constant 0 : i32
    %c0_i32_0 = arith.constant 0 : i32
    %c0_i32_1 = arith.constant 0 : i32
    return %arg1, %c0_i32, %c0_i32_0 : i32, i32, i32
  }
  func.func @transform_7(%arg0: i32, %arg1: i32) -> (i32, i32, i32) {
    %c0_i32 = arith.constant 0 : i32
    %c0_i32_0 = arith.constant 0 : i32
    %c0_i32_1 = arith.constant 0 : i32
    return %arg1, %c0_i32, %c0_i32_0 : i32, i32, i32
  }
  func.func @transform_8(%arg0: i32, %arg1: i32) -> (i32, i32, i32) {
    %c0_i32 = arith.constant 0 : i32
    %c0_i32_0 = arith.constant 0 : i32
    %c0_i32_1 = arith.constant 0 : i32
    return %arg1, %c0_i32, %c0_i32_0 : i32, i32, i32
  }
  func.func @transform_9(%arg0: i32, %arg1: i32) -> (i32, i32, i32) {
    %c0_i32 = arith.constant 0 : i32
    %c0_i32_0 = arith.constant 0 : i32
    %c0_i32_1 = arith.constant 0 : i32
    return %arg1, %c0_i32, %c0_i32_0 : i32, i32, i32
  }
  func.func @transform_10(%arg0: i32, %arg1: i32) -> (i32, i32, i32) {
    %c0_i32 = arith.constant 0 : i32
    %c0_i32_0 = arith.constant 0 : i32
    %c0_i32_1 = arith.constant 0 : i32
    return %arg1, %c0_i32, %c0_i32_0 : i32, i32, i32
  }
  func.func @transform_11(%arg0: i32, %arg1: i32) -> (i32, i32, i32) {
    %c0_i32 = arith.constant 0 : i32
    %c0_i32_0 = arith.constant 0 : i32
    %c0_i32_1 = arith.constant 0 : i32
    return %arg1, %c0_i32, %c0_i32_0 : i32, i32, i32
  }
  func.func @transform_12(%arg0: i32, %arg1: i32) -> (i32, i32, i32) {
    %c0_i32 = arith.constant 0 : i32
    %c0_i32_0 = arith.constant 0 : i32
    %c0_i32_1 = arith.constant 0 : i32
    return %arg1, %c0_i32, %c0_i32_0 : i32, i32, i32
  }
  func.func @transform_13(%arg0: i32, %arg1: i32) -> (i32, i32, i32) {
    %c0_i32 = arith.constant 0 : i32
    %c0_i32_0 = arith.constant 0 : i32
    %c0_i32_1 = arith.constant 0 : i32
    return %arg1, %c0_i32, %c0_i32_0 : i32, i32, i32
  }
  func.func @transform_14(%arg0: i32, %arg1: i32) -> (i32, i32, i32) {
    %c0_i32 = arith.constant 0 : i32
    %c0_i32_0 = arith.constant 0 : i32
    %c0_i32_1 = arith.constant 0 : i32
    return %arg0, %c0_i32, %c0_i32_0 : i32, i32, i32
  }
}

</mosaic_0001>

<bundles_post_ra>
// kernel: tpu_custom_call.1
= control target key start
LH: loop header
LB: loop body
LE: loop exit
PB: predicated region body
PF: predicated region fallthrough
CT: control target
= control target key end

     0   :  { %s4417_s0 = inlined_call_operand.hbm [shape: f32[2,8,128], index: 0, kind: input, shape index: {}]   ;;  %s4418_s1 = inlined_call_operand.hbm [shape: f32[8,128], index: 1, kind: input, shape index: {}]   ;;  %s4419_s2 = inlined_call_operand.vmem [shape: f32[2,1,128], index: 2, kind: input, shape index: {}]   ;;  %s4420_s3 = inlined_call_operand.hbm [shape: f32[2,1,128], index: 3, kind: input, shape index: {}]   ;;  %s4421_s4 = inlined_call_operand.hbm [shape: bf16[2,128,384], index: 4, kind: input, shape index: {}]   ;;  %s4422_s5 = inlined_call_operand.vmem [shape: f32[2,1,384], index: 5, kind: input, shape index: {}]   ;;  %s4423_s6 = inlined_call_operand.hbm [shape: bf16[2,128,128], index: 6, kind: input, shape index: {}]   ;;  %s4424_s7 = inlined_call_operand.hbm [shape: f32[2,1,128], index: 7, kind: input, shape index: {}]   ;;  %s4425_s8 = inlined_call_operand.hbm [shape: f32[2,1,128], index: 8, kind: input, shape index: {}]   ;;  %s4426_s9 = inlined_call_operand.hbm [shape: f32[2,1,128], index: 9, kind: input, shape index: {}]   ;;  %s4427_s10 = inlined_call_operand.hbm [shape: bf16[2,128,512], index: 10, kind: input, shape index: {}]   ;;  %s4428_s11 = inlined_call_operand.vmem [shape: f32[2,1,512], index: 11, kind: input, shape index: {}]   ;;  %s4429_s12 = inlined_call_operand.hbm [shape: bf16[2,512,128], index: 12, kind: input, shape index: {}]   ;;  %s4430_s13 = inlined_call_operand.vmem [shape: f32[2,1,128], index: 13, kind: input, shape index: {}]   ;;  %s4431_s14 = inlined_call_operand.hbm [shape: f32[2,8,128], index: 14, kind: output, shape index: {}]  }
   0x1   :  { %4442 = sst [smem:[#allocation28_spill]] %s4417_s0 }
   0x2   :  { %4443 = sst [smem:[#allocation29_spill]] %s4418_s1 }
   0x3   :  { %4444 = sst [smem:[#allocation30_spill]] %s4419_s2 }
   0x4   :  { %4445 = sst [smem:[#allocation31_spill]] %s4420_s3 }
   0x5   :  { %4446 = sst [smem:[#allocation32_spill]] %s4421_s4 }
   0x6   :  { %4447 = sst [smem:[#allocation33_spill]] %s4422_s5 }
   0x7   :  { %4448 = sst [smem:[#allocation34_spill]] %s4423_s6 }
   0x8   :  { %4449 = sst [smem:[#allocation35_spill]] %s4424_s7 }
   0x9   :  { %4450 = sst [smem:[#allocation36_spill]] %s4425_s8 }
   0xa   :  { %4451 = sst [smem:[#allocation37_spill]] %s4428_s11 }
   0xb   :  { %4452 = sst [smem:[#allocation38_spill]] %s4430_s13 }
   0xc   :  { %4453 = sst [smem:[#allocation39_spill]] %s4431_s14 }
   0xd   :  { %19 = vsyncpa [#allocation4], 0 }
   0xe   :  { %20 = vsyncpa [#allocation7], 0 }
   0xf   :  { %21 = vsyncpa [#allocation5], 0  ;;  %s3838_s29 = smov 0   ;;  %s3840_s30 = smov 0  }
  0x10   :  { %s3842_s15 = smov 0   ;;  %s3844_s16 = smov 0  }
  0x11   :  { %s3846_s17 = smov 0   ;;  %s3848_s18 = smov 0  }
  0x12 LB: > { %4454 = sst [smem:[#allocation21_spill]] %s3720_s30  ;;  %s3867_s19 = sadd.s32 4294967295, %s3736_s18   ;;  %s3736_s18 = sphi %s3848_s18, %s27_s18   ;;  %s3732_s17 = sphi %s3846_s17, %s4499_s17   ;;  %s3728_s16 = sphi %s3844_s16, %s4498_s16   ;;  %s3724_s15 = sphi %s3842_s15, %s4496_s15   ;;  %s3720_s30 = sphi %s3840_s30, %s4495_s30   ;;  %s3716_s29 = sphi %s3838_s29, %s4494_s29  }
  0x13   : > { %4455 = sst [smem:[#allocation22_spill]] %s3724_s15  ;;  %p126_p0 = scmp.ne.s32.totalorder %s3724_s15, %s3720_s30 }
  0x14   : > { %4456 = sst [smem:[#allocation23_spill]] %s3728_s16  ;;  %p127_p1 = scmp.eq.s32.totalorder %s3736_s18, 0 }
  0x15   : > { %4457 = sst [smem:[#allocation24_spill]] %s3736_s18  ;;  %p132_p2 = scmp.ne.s32.totalorder %s3720_s30, %s3716_s29 }
  0x16   : > { %p4432_p3 = scmp.eq.s32.totalorder %s3867_s19, 0  ;;  %p128_p4 = por %p127_p1, %p126_p0 }
  0x17   : > { %p2739_p5 = scmp.ge.s32.totalorder %s3736_s18, 1  ;;  %p429_p7 = scmp.lt.s32.totalorder %s3736_s18, 3 }
  0x18   : > { %p3878_p6 = por %p4432_p3, %p132_p2  ;;  %s3738_s23 = smov [#allocation3]  }
  0x19   : > { %p3883_p8 = pnand %p2739_p5, %p429_p7  ;;  %s444_s24 = sshll.u32 %s3738_s23, 4  ;;  %s445_s24 = int_to_ptr.vmem [resolvable:$true] %s444_s24 }
  0x1a   : > { %s4458_s21 = scalar_select %p3878_p6, 1, 0 }
  0x1b   : > { %s4460_s22 = scalar_select %p3883_p8, 1, 0 }
  0x1c   : > { %4459 = sst [smem:[#allocation25_spill]] %s4458_s21  ;;  %p3089_p9 = pneg %p3883_p8 }
  0x1d   : > { %p3123_p10 = scmp.lt.s32.totalorder %s3736_s18, 2  ;;  %s36_s27 = sadd.s32 1, %s3732_s17 }
  0x1e   : > { %p3892_p11 = pnand %p3089_p9, %p4432_p3  ;;  %s3385_s28 = scalar_lea.vmem %s445_s24, 256 }
  0x1f   : > { %p3896_p12 = pnand %p3123_p10, %p128_p4  ;;  %p3386_p0 = scmp.ne.s32.totalorder %s445_s24, %s3385_s28 }
  0x20   : > { %p3376_p13 = pneg %p3892_p11  ;;  %p3393_p5 = scmp.lt.s32.totalorder %s445_s24, %s445_s24 }
  0x21   : > { %p3394_p7 = scmp.lt.s32.totalorder %s3385_s28, %s3385_s28 }
  0x22   : > { %p3388_p1 = pnand %p3386_p0, %p3376_p13 }
  0x23   : > { %p3395_p9 = por %p3394_p7, %p3393_p5 }
  0x24   : > { %p3389_p2 = pneg %p3388_p1 }
  0x26   : > { %p3396_p3 = pnand %p3395_p9, %p3389_p2 }
  0x28   : > { %3399 = shalt.err (!%p3396_p3)
}
  0x29   : > { %s3739_s29 = smov 128   ;;  %s3740_s23 = smov 8  }
  0x2a   : > { %s4463_s0 = sld [smem:[#allocation28_spill]]  ;;  %p37_p4 = scmp.ge.s32.totalorder %s36_s27, 2 }
  0x2b   : > { %s475_s28 = sand.u32 1, %s3736_s18   ;;  %s3913_s11 = sand.u32 1, %s3724_s15  }
  0x2c   : > { %s4501_s27 = smov (%p37_p4, %s36_s27), 0  ;;  %s3920_s13 = sshll.u32 %s3732_s17, 4 }
  0x2d   : > { %4464 = sst [smem:[#allocation26_spill]] %s4501_s27  ;;  %s116_s5 = ssub.s32 %s3732_s17, %s4501_s27 }
  0x2e   : > { %p117_p3 = scmp.eq.s32.totalorder %s116_s5, 0  ;;  %s4465_s3 = sld [smem:[#allocation31_spill]] }
  0x2f   : > { %s478_s20 = scalar_lea.vmem [#allocation8], %s3913_s11  ;;  %s3933_s18 = scalar_lea.sflag [#allocation4], %s475_s28 }
  0x30   : > { %3092 = dma.hbm_to_vmem [thread:$0]  (!%p3892_p11), %s4463_s0, 256, %s445_s24, [#allocation4], %s3739_s29, %s3739_s29, %s3740_s23  }
  0x31   : > { %s485_s24 = sshll.u32 %s478_s20, 4  ;;  %s3057_s29 = smul.u32 192, %s3913_s11  ;;  %s486_s24 = int_to_ptr.vmem [resolvable:$true] %s485_s24 }
  0x32   : > { %s4466_s23 = sadd.s32 1, %s3724_s15  ;;  %p3937_p10 = pneg %p3896_p12 }
  0x33   : > { %s3931_s0 = scalar_select %p117_p3, %s3724_s15, %s4466_s23  }
  0x34   : > { %s483_s14 = scalar_lea.hbm %s4465_s3, %s3920_s13  ;;  %s3413_s5 = scalar_lea.vmem %s486_s24, 16 }
  0x35   : > { %4467 = sst [smem:[#allocation27_spill]] %s3931_s0  ;;  %p3414_p0 = scmp.ne.s32.totalorder %s486_s24, %s3413_s5 }
  0x36   : > { %s3741_s2 = smov [#allocation8]  }
  0x37   : > { %p3416_p1 = pnand %p3414_p0, %p3937_p10  ;;  %s3418_s16 = sshll.u32 %s3741_s2, 4  ;;  %s3419_s16 = int_to_ptr.vmem [resolvable:$false] %s3418_s16 }
  0x38   : > { %s3420_s20 = scalar_lea.vmem %s3419_s16, 32  ;;  %p3421_p5 = scmp.lt.s32.totalorder %s486_s24, %s3419_s16 }
  0x39   : > { %p3417_p2 = pneg %p3416_p1  ;;  %p3422_p7 = scmp.lt.s32.totalorder %s3420_s20, %s3413_s5 }
  0x3b   : > { %p3423_p9 = por %p3422_p7, %p3421_p5 }
  0x3d   : > { %p3424_p4 = pnand %p3423_p9, %p3417_p2 }
  0x3f   : > { %3427 = shalt.err (!%p3424_p4)
}
  0x40   : > { %3099 = dma.hbm_to_vmem [thread:$0]  (!%p3896_p12), %s483_s14, 16, %s486_s24, %s3933_s18  }
  0x41   : > { %s3058_s28 = smul.u32 3072, %s3732_s17  ;;  %s496_s23 = scalar_lea.vmem [#allocation9], %s3057_s29 }
  0x42   : > { %s503_s3 = sshll.u32 %s496_s23, 4  ;;  %s4469_s4 = sld [smem:[#allocation32_spill]]  ;;  %s504_s3 = int_to_ptr.vmem [resolvable:$true] %s503_s3 }
  0x43   : > { %s3441_s21 = scalar_lea.vmem %s504_s3, 3072  ;;  %s3742_s5 = smov [#allocation9]  }
  0x44   : > { %p3442_p3 = scmp.ne.s32.totalorder %s504_s3, %s3441_s21  ;;  %s3446_s16 = sshll.u32 %s3742_s5, 4  ;;  %s3447_s16 = int_to_ptr.vmem [resolvable:$false] %s3446_s16 }
  0x45   : > { %s3448_s20 = scalar_lea.vmem %s3447_s16, 6144  ;;  %p3449_p2 = scmp.lt.s32.totalorder %s504_s3, %s3447_s16 }
  0x46   : > { %p3444_p0 = pnand %p3442_p3, %p3937_p10  ;;  %p3450_p5 = scmp.lt.s32.totalorder %s3448_s20, %s3441_s21 }
  0x48   : > { %s502_s2 = scalar_lea.hbm %s4469_s4, %s3058_s28  ;;  %p3445_p1 = pneg %p3444_p0 }
  0x49   : > { %p3451_p7 = por %p3450_p5, %p3449_p2 }
  0x4b   : > { %p3452_p9 = pnand %p3451_p7, %p3445_p1 }
  0x4d   : > { %3455 = shalt.err (!%p3452_p9)
}
  0x4e   : > { %s3743_s14 = smov 192   ;;  %s3744_s0 = smov 12  }
  0x4f   : > { %3102 = dma.hbm_to_vmem [thread:$0]  (!%p3896_p12), %s502_s2, 3072, %s504_s3, %s3933_s18, %s3743_s14, %s3743_s14, %s3744_s0  }
  0x50   : > { %s2745_s15 = sshll.u32 %s3913_s11, 6  ;;  %s2888_s24 = sshll.u32 %s3732_s17, 10 }
  0x51   : > { %s4470_s6 = sld [smem:[#allocation34_spill]]  ;;  %s524_s5 = scalar_lea.vmem [#allocation10], %s2745_s15 }
  0x52   : > { %s531_s21 = sshll.u32 %s524_s5, 4  ;;  %s3745_s20 = smov [#allocation10]   ;;  %s532_s21 = int_to_ptr.vmem [resolvable:$true] %s531_s21 }
  0x53   : > { %s3469_s16 = scalar_lea.vmem %s532_s21, 1024  ;;  %s3474_s4 = sshll.u32 %s3745_s20, 4  ;;  %s3475_s4 = int_to_ptr.vmem [resolvable:$false] %s3474_s4 }
  0x54   : > { %p3470_p4 = scmp.ne.s32.totalorder %s532_s21, %s3469_s16  ;;  %s3476_s30 = scalar_lea.vmem %s3475_s4, 2048 }
  0x55   : > { %p3477_p1 = scmp.lt.s32.totalorder %s532_s21, %s3475_s4  ;;  %p3478_p2 = scmp.lt.s32.totalorder %s3476_s30, %s3469_s16 }
  0x56   : > { %p3472_p3 = pnand %p3470_p4, %p3937_p10 }
  0x57   : > { %s530_s23 = scalar_lea.hbm %s4470_s6, %s2888_s24  ;;  %p3479_p5 = por %p3478_p2, %p3477_p1 }
  0x58   : > { %p3473_p0 = pneg %p3472_p3 }
  0x5a   : > { %p3480_p7 = pnand %p3479_p5, %p3473_p0 }
  0x5c   : > { %3483 = shalt.err (!%p3480_p7)
}
  0x5d   : > { %s3746_s3 = smov 64   ;;  %s3747_s2 = smov 4  }
  0x5e   : > { %3105 = dma.hbm_to_vmem [thread:$0]  (!%p3896_p12), %s530_s23, 1024, %s532_s21, %s3933_s18, %s3746_s3, %s3746_s3, %s3747_s2  }
  0x5f   : > { %s4471_s7 = sld [smem:[#allocation35_spill]]  ;;  %s544_s30 = scalar_lea.vmem [#allocation11], %s3913_s11 }
  0x60   : > { %s551_s15 = sshll.u32 %s544_s30, 4  ;;  %s4472_s8 = sld [smem:[#allocation36_spill]]  ;;  %s552_s15 = int_to_ptr.vmem [resolvable:$true] %s551_s15 }
  0x61   : > { %s3497_s5 = scalar_lea.vmem %s552_s15, 16  ;;  %s3748_s16 = smov [#allocation11]  }
  0x62   : > { %p3498_p9 = scmp.ne.s32.totalorder %s552_s15, %s3497_s5  ;;  %s3502_s20 = sshll.u32 %s3748_s16, 4  ;;  %s3503_s20 = int_to_ptr.vmem [resolvable:$false] %s3502_s20 }
  0x63   : > { %s3504_s23 = scalar_lea.vmem %s3503_s20, 32  ;;  %p3505_p0 = scmp.lt.s32.totalorder %s552_s15, %s3503_s20 }
  0x64   : > { %p3500_p4 = pnand %p3498_p9, %p3937_p10  ;;  %p3506_p1 = scmp.lt.s32.totalorder %s3504_s23, %s3497_s5 }
  0x65   : > { %s549_s4 = scalar_lea.hbm %s4471_s7, %s3920_s13 }
  0x66   : > { %s566_s28 = scalar_lea.hbm %s4472_s8, %s3920_s13  ;;  %p3501_p3 = pneg %p3500_p4 }
  0x67   : > { %p3507_p2 = por %p3506_p1, %p3505_p0 }
  0x69   : > { %p3508_p5 = pnand %p3507_p2, %p3501_p3 }
  0x6b   : > { %3511 = shalt.err (!%p3508_p5)
}
  0x6c   : > { %3108 = dma.hbm_to_vmem [thread:$0]  (!%p3896_p12), %s549_s4, 16, %s552_s15, %s3933_s18  }
  0x6d   : > { %s561_s21 = scalar_lea.vmem [#allocation12], %s3913_s11  ;;  %s583_s24 = scalar_lea.hbm %s4426_s9, %s3920_s13 }
  0x6e   : > { %s568_s14 = sshll.u32 %s561_s21, 4  ;;  %s3749_s5 = smov [#allocation12]   ;;  %s569_s14 = int_to_ptr.vmem [resolvable:$true] %s568_s14 }
  0x6f   : > { %s3525_s29 = scalar_lea.vmem %s569_s14, 16  ;;  %s3530_s16 = sshll.u32 %s3749_s5, 4  ;;  %s3531_s16 = int_to_ptr.vmem [resolvable:$false] %s3530_s16 }
  0x70   : > { %p3526_p7 = scmp.ne.s32.totalorder %s569_s14, %s3525_s29  ;;  %s3532_s20 = scalar_lea.vmem %s3531_s16, 32 }
  0x71   : > { %p3533_p3 = scmp.lt.s32.totalorder %s569_s14, %s3531_s16  ;;  %p3534_p0 = scmp.lt.s32.totalorder %s3532_s20, %s3525_s29 }
  0x72   : > { %p3528_p9 = pnand %p3526_p7, %p3937_p10 }
  0x73   : > { %p3535_p1 = por %p3534_p0, %p3533_p3 }
  0x74   : > { %p3529_p4 = pneg %p3528_p9 }
  0x76   : > { %p3536_p2 = pnand %p3535_p1, %p3529_p4 }
  0x78   : > { %3539 = shalt.err (!%p3536_p2)
}
  0x79   : > { %3111 = dma.hbm_to_vmem [thread:$0]  (!%p3896_p12), %s566_s28, 16, %s569_s14, %s3933_s18  }
  0x7a   : > { %s578_s23 = scalar_lea.vmem [#allocation13], %s3913_s11  ;;  %s2751_s0 = sshll.u32 %s3913_s11, 8 }
  0x7b   : > { %s585_s21 = sshll.u32 %s578_s23, 4  ;;  %s3750_s29 = smov [#allocation13]   ;;  %s586_s21 = int_to_ptr.vmem [resolvable:$true] %s585_s21 }
  0x7c   : > { %s3553_s30 = scalar_lea.vmem %s586_s21, 16  ;;  %s3558_s5 = sshll.u32 %s3750_s29, 4  ;;  %s3559_s5 = int_to_ptr.vmem [resolvable:$false] %s3558_s5 }
  0x7d   : > { %p3554_p5 = scmp.ne.s32.totalorder %s586_s21, %s3553_s30  ;;  %s3560_s16 = scalar_lea.vmem %s3559_s5, 32 }
  0x7e   : > { %p3561_p4 = scmp.lt.s32.totalorder %s586_s21, %s3559_s5  ;;  %p3562_p3 = scmp.lt.s32.totalorder %s3560_s16, %s3553_s30 }
  0x7f   : > { %p3556_p7 = pnand %p3554_p5, %p3937_p10 }
  0x80   : > { %p3563_p0 = por %p3562_p3, %p3561_p4 }
  0x81   : > { %p3557_p9 = pneg %p3556_p7 }
  0x83   : > { %p3564_p1 = pnand %p3563_p0, %p3557_p9 }
  0x85   : > { %3567 = shalt.err (!%p3564_p1)
}
  0x86   : > { %3114 = dma.hbm_to_vmem [thread:$0]  (!%p3896_p12), %s583_s24, 16, %s586_s21, %s3933_s18  }
  0x87   : > { %s2889_s20 = sshll.u32 %s3732_s17, 12  ;;  %s596_s4 = scalar_lea.vmem [#allocation14], %s2751_s0 }
  0x88   : > { %s603_s15 = sshll.u32 %s596_s4, 4  ;;  %s602_s29 = scalar_lea.hbm %s4427_s10, %s2889_s20  ;;  %s604_s15 = int_to_ptr.vmem [resolvable:$true] %s603_s15 }
  0x89   : > { %s3581_s5 = scalar_lea.vmem %s604_s15, 4096  ;;  %s3751_s16 = smov [#allocation14]  }
  0x8a   : > { %p3582_p2 = scmp.ne.s32.totalorder %s604_s15, %s3581_s5  ;;  %s3586_s13 = sshll.u32 %s3751_s16, 4  ;;  %s3587_s13 = int_to_ptr.vmem [resolvable:$false] %s3586_s13 }
  0x8b   : > { %s3588_s28 = scalar_lea.vmem %s3587_s13, 8192  ;;  %p3589_p9 = scmp.lt.s32.totalorder %s604_s15, %s3587_s13 }
  0x8c   : > { %p3584_p5 = pnand %p3582_p2, %p3937_p10  ;;  %p3590_p4 = scmp.lt.s32.totalorder %s3588_s28, %s3581_s5 }
  0x8e   : > { %p3585_p7 = pneg %p3584_p5  ;;  %p3591_p3 = por %p3590_p4, %p3589_p9 }
  0x90   : > { %p3592_p0 = pnand %p3591_p3, %p3585_p7 }
  0x92   : > { %3595 = shalt.err (!%p3592_p0)
}
  0x93   : > { %s3752_s24 = smov 256   ;;  %s3753_s21 = smov 16  }
  0x94   : > { %3117 = dma.hbm_to_vmem [thread:$0]  (!%p3896_p12), %s602_s29, 4096, %s604_s15, %s3933_s18, %s3752_s24, %s3752_s24, %s3753_s21  }
  0x95   : > { %s3754_s14 = smov [#allocation6]   ;;  %s4023_s16 = scalar_lea.hbm %s4429_s12, %s2889_s20 }
  0x96   : > { %s458_s4 = sshll.u32 %s3754_s14, 4  ;;  %s624_s5 = scalar_lea.vmem [#allocation15], %s2751_s0  ;;  %s459_s4 = int_to_ptr.vmem [resolvable:$true] %s458_s4 }
  0x97   : > { %s631_s13 = sshll.u32 %s624_s5, 4  ;;  %s3607_s28 = scalar_lea.vmem %s459_s4, 128  ;;  %s632_s13 = int_to_ptr.vmem [resolvable:$true] %s631_s13 }
  0x98   : > { %p3608_p1 = scmp.ne.s32.totalorder %s459_s4, %s3607_s28  ;;  %p3615_p7 = scmp.lt.s32.totalorder %s459_s4, %s459_s4 }
  0x99   : > { %p3616_p9 = scmp.lt.s32.totalorder %s3607_s28, %s3607_s28 }
  0x9a   : > { %p3610_p2 = pnand %p3608_p1, %p3376_p13 }
  0x9b   : > { %p3617_p4 = por %p3616_p9, %p3615_p7 }
  0x9c   : > { %p3611_p5 = pneg %p3610_p2 }
  0x9e   : > { %p3618_p3 = pnand %p3617_p4, %p3611_p5 }
  0xa0   : > { %3621 = shalt.err (!%p3618_p3)
}
  0xa1   : > { %s4473_s1 = sld [smem:[#allocation29_spill]]  ;;  %s3635_s11 = scalar_lea.vmem %s632_s13, 4096 }
  0xa2   : > { %p3636_p0 = scmp.ne.s32.totalorder %s632_s13, %s3635_s11  ;;  %s3755_s0 = smov [#allocation15]  }
  0xa3   : > { %s3640_s29 = sshll.u32 %s3755_s0, 4  ;;  %s3641_s29 = int_to_ptr.vmem [resolvable:$false] %s3640_s29 }
  0xa4   : > { %p3638_p6 = pnand %p3636_p0, %p3937_p10  ;;  %s3642_s24 = scalar_lea.vmem %s3641_s29, 8192 }
  0xa5   : > { %p3643_p13 = scmp.lt.s32.totalorder %s632_s13, %s3641_s29  ;;  %p3644_p1 = scmp.lt.s32.totalorder %s3642_s24, %s3635_s11 }
  0xa6   : > { %p3639_p8 = pneg %p3638_p6 }
  0xa7   : > { %3095 = dma.hbm_to_vmem [thread:$0]  (!%p3892_p11), %s4473_s1, 128, %s459_s4, [#allocation7]  }
  0xa8   : > { %p3645_p2 = por %p3644_p1, %p3643_p13 }
  0xaa   : > { %p3646_p5 = pnand %p3645_p2, %p3639_p8 }
  0xac   : > { %3649 = shalt.err (!%p3646_p5)
}
  0xad   : > { %3120 = dma.hbm_to_vmem [thread:$0]  (!%p3896_p12), %s4023_s16, 4096, %s632_s13, %s3933_s18, %s3746_s3, %s3746_s3, %s3747_s2  }
  0xae   : > { %p4474_p11 = scmp.ne.s32.totalorder %s4460_s22, 0 }
  0xaf   : > { %p4475_p6 = scmp.eq.s32.totalorder (!%p4474_p11), %s3867_s19, 0 }
  0xb0   : > { %649 = sbr.rel (%p4474_p11) target bundleno = 3071 (0xbff), region = 76 }
  0xb5   : > { %3699 = dma.done.wait (%p4475_p6), [#allocation4], 256   ;;  %p4476_p10 = pmov %p4475_p6 }
  0xb6   : > { %p4477_p8 = pmov %p4475_p6 }
  0xb7   : > { %3701 = vsyncadd (%p4476_p10), [#allocation4], 4294967040 }
  0xb8   : > { %3703 = dma.done.wait (%p4477_p8), [#allocation7], 128   ;;  %p4478_p7 = pmov %p4475_p6 }
  0xb9   : > { %s4479_s25 = sld [smem:[#allocation21_spill]]  ;;  %s659_s27 = sand.u32 1, %s3867_s19  }
  0xba   : > { %3705 = vsyncadd (%p4478_p7), [#allocation7], 4294967168  ;;  %s4480_s26 = sld [smem:[#allocation25_spill]]  ;;  %s660_s22 = scalar_lea.sflag [#allocation4], %s659_s27 }
  0xbf   : > { %s4056_s18 = sand.u32 1, %s4479_s25  }
  0xc0   : > { %p4481_p12 = scmp.ne.s32.totalorder %s4480_s26, 0 }
  0xc2   : > { %3707 = dma.done.wait (%p4481_p12), %s660_s22, 12352  }
  0xc3   : > { %3709 = vsyncadd (%p4481_p12), %s660_s22, 4294954944  ;;  %s4482_s2 = sld [smem:[#allocation23_spill]]  ;;  %s3059_s21 = smul.u32 192, %s4056_s18 }
  0xc4   : > { %s2760_s14 = sshll.u32 %s4056_s18, 6  ;;  %s2761_s4 = sshll.u32 %s4056_s18, 8 }
  0xc5   : > { %s4484_s0 = sld [smem:[#allocation38_spill]]  ;;  %s4090_s30 = scalar_lea.vmem [#allocation9], %s3059_s21 }
  0xc6   : > { %s4485_s26 = sld [smem:[#allocation33_spill]]  ;;  %s4092_s16 = scalar_lea.vmem [#allocation10], %s2760_s14 }
  0xc7   : > { %s4486_s1 = sld [smem:[#allocation37_spill]]  ;;  %s688_s5 = scalar_lea.vmem [#allocation11], %s4056_s18 }
  0xc8   : > { %s696_s13 = scalar_lea.vmem [#allocation12], %s4056_s18  ;;  %s704_s7 = scalar_lea.vmem [#allocation13], %s4056_s18 }
  0xc9   : > { %p808_p9 = scmp.lt.s32.totalorder %s4482_s2, 1  ;;  %s4097_s8 = scalar_lea.vmem [#allocation14], %s2761_s4 }
  0xca   : > { %s4099_s20 = scalar_lea.vmem [#allocation15], %s2761_s4  ;;  %p2764_p4 = scmp.ne.s32.totalorder %s4482_s2, 0 }
  0xcb   : > { %s4068_s23 = scalar_select %p808_p9, %s4482_s2, 1 }
  0xcc   : > { %827 = sbr.rel (%p2764_p4) target bundleno = 213 (0xd5), region = 120 }
  0xcd   : > { %s3060_s28 = smul.u32 3, %s4068_s23  ;;  %s2763_s15 = sshll.u32 %s4068_s23, 2 }
  0xce   : > { %s821_s29 = scalar_lea.vmem %s4484_s0, %s4068_s23  ;;  %s4088_s6 = scalar_lea.vmem %s4486_s1, %s2763_s15 }
  0xcf   : > { %s4083_s27 = scalar_lea.vmem %s4485_s26, %s3060_s28 }
  0xd1   : > { %v828_v0 = vld [vmem:[#allocation3] sm:$0xff]  ;;  %v830_v1 = vld [vmem:[#allocation6] sm:$0xff]  ;;  %v829_v2 = vld [vmem:[#allocation3 + $0x8] sm:$0xff] }
  0xd2   : > { %v831_v3 = vadd.f32 %v830_v1, %v828_v0  ;;  %v832_v4 = vadd.f32 %v830_v1, %v829_v2 }
  0xd4   : > { %833 = vst [vmem:[#allocation2] sm:$0xff] %v831_v3  ;;  %834 = vst [vmem:[#allocation2 + $0x8] sm:$0xff] %v832_v4 }
  0xd5 PF: > { %v3198_v7 = vld [vmem:[%s4090_s30 + $0xac] ss:$12 sps:$4 sm:$0xff]   ;;  %v3200_v8 = vld [vmem:[%s4090_s30 + $0xa8] ss:$12 sps:$4 sm:$0xff]   ;;  %v3756_v9 = vmov 0.0   ;;  %v3757_v32 = vmov 0   ;;  %v913_v58 = vlaneseq }
  0xd6   : > { %2969 = vmatprep.subr.bf16.mxu1 %v3756_v9  ;;  %v3201_v10 = vld [vmem:[%s4090_s30 + $0xb0] ss:$12 sps:$4 sm:$0xff]   ;;  %1056 = vmatprep.subr.bf16.mxu0 %v3198_v7  ;;  %v3202_v19 = vld [vmem:[%s4090_s30 + $0x94] ss:$12 sps:$4 sm:$0xff]   ;;  %v3205_v21 = vld [vmem:[%s4090_s30 + $0x98] ss:$12 sps:$4 sm:$0xff]  }
  0xd7   : > { %1057 = vmatpush1.bf16.msra.mxu0 %v3200_v8  ;;  %2970 = vmatpush3.bf16.msra.mxu1 %v3201_v10  ;;  %v3204_v20 = vld [vmem:[%s4090_s30 + $0x90] ss:$12 sps:$4 sm:$0xff]   ;;  %v3208_v23 = vld [vmem:[%s4090_s30 + $0x78] ss:$12 sps:$4 sm:$0xff]   ;;  %v3209_v24 = vld [vmem:[%s4090_s30 + $0x80] ss:$12 sps:$4 sm:$0xff]  }
  0xd8   : > { %2971 = vmatprep.subr.bf16.mxu1 %v3756_v9  ;;  %1058 = vmatprep.subr.bf16.mxu0 %v3202_v19  ;;  %v3206_v22 = vld [vmem:[%s4090_s30 + $0x7c] ss:$12 sps:$4 sm:$0xff]   ;;  %v3210_v25 = vld [vmem:[%s4090_s30 + $0x64] ss:$12 sps:$4 sm:$0xff]   ;;  %v3212_v26 = vld [vmem:[%s4090_s30 + $0x60] ss:$12 sps:$4 sm:$0xff]  }
  0xd9   : > { %v3213_v27 = vld [vmem:[%s4090_s30 + $0x68] ss:$12 sps:$4 sm:$0xff]   ;;  %v3214_v28 = vld [vmem:[%s4090_s30 + $0x4c] ss:$12 sps:$4 sm:$0xff]   ;;  %v3217_v30 = vld [vmem:[%s4090_s30 + $0x50] ss:$12 sps:$4 sm:$0xff]   ;;  %1088 = vmatprep.mubr.bf16.mxu0 %v3757_v32 }
  0xda   : > { %v3216_v29 = vld [vmem:[%s4090_s30 + $0x48] ss:$12 sps:$4 sm:$0xff]   ;;  %vm3758_vm0 = vmmov 0   ;;  %v3220_v33 = vld [vmem:[%s4090_s30 + $0x30] ss:$12 sps:$4 sm:$0xff]   ;;  %s4487_s2 = sld [smem:[#allocation30_spill]] }
  0xdb   : > { %v4102_v5 = vld [vmem:[#allocation2] sm:$0xff]  ;;  %v4104_v6 = vld [vmem:[#allocation2 + $0x8] sm:$0xff]  ;;  %1059 = vmatpush1.bf16.msra.mxu0 %v3204_v20  ;;  %2972 = vmatpush3.bf16.msra.mxu1 %v3205_v21  ;;  %s4489_s14 = scalar_lea.vmem [#allocation8], %s4056_s18  ;;  %v4168_v59 = vshrl.u32 %v913_v58, 7  ;;  %vm1146_vm1 = vcmask 523264   ;;  %vm1267_vm2 = vcmask 1043456  }
  0xdc   : > { %839 = vadd.xlane.f32.xlu0 %v4102_v5  ;;  %2973 = vmatprep.subr.bf16.mxu1 %v3756_v9  ;;  %v3218_v31 = vld [vmem:[%s4090_s30 + $0x34] ss:$12 sps:$4 sm:$0xff]   ;;  %v3221_v34 = vld [vmem:[%s4090_s30 + $0x38] ss:$12 sps:$4 sm:$0xff]   ;;  %v3222_v35 = vld [vmem:[%s4090_s30 + $0x1c] ss:$12 sps:$4 sm:$0xff]  }
  0xdd   : > { %1060 = vmatprep.subr.bf16.mxu0 %v3206_v22  ;;  %2985 = vmatprep.mubr.msk.bf16.mxu1 %vm3758_vm0, %v3756_v9  ;;  %v3224_v36 = vld [vmem:[%s4090_s30 + $0x18] ss:$12 sps:$4 sm:$0xff]   ;;  %v3225_v37 = vld [vmem:[%s4090_s30 + $0x20] ss:$12 sps:$4 sm:$0xff]   ;;  %v3229_v40 = vld [vmem:[%s4090_s30 + $0x8] ss:$12 sps:$4 sm:$0xff]  }
  0xde   : > { %v3226_v38 = vld [vmem:[%s4090_s30 + $0x4] ss:$12 sps:$4 sm:$0xff]   ;;  %v3228_v39 = vld [vmem:[%s4090_s30] ss:$12 sps:$4 sm:$0xff]   ;;  %v2766_v53 = vld [vmem:[%s4489_s14] ss:$0 sm:$0xff] }
  0xdf   : > { %1061 = vmatpush1.bf16.msra.mxu0 %v3208_v23  ;;  %2974 = vmatpush3.bf16.msra.mxu1 %v3209_v24  ;;  %v919_v60 = vsub.s32 1, %v4168_v59  ;;  %v911_v61 = vld [vmem:[%s4083_s27] sm:$0x7]  ;;  %v923_v62 = vsub.s32 2, %v4168_v59  ;;  %v915_v2 = vsub.s32 0, %v4168_v59  ;;  %vm1239_vm3 = vcmask 64512  }
  0xe0   : > { %841 = vadd.xlane.f32.xlu0 %v4104_v6  ;;  %2975 = vmatprep.subr.bf16.mxu1 %v3756_v9  ;;  %s4488_s21 = scalar_lea.vmem %s4487_s2, %s4068_s23  ;;  %s3759_s4 = smov 64  }
  0xe1   : > { %1062 = vmatprep.subr.bf16.mxu0 %v3210_v25  ;;  %v2765_v49 = vld [vmem:[%s4488_s21] ss:$0 sm:$0xff]  ;;  %v920_v63 = vrot.slane %v911_v61, %v919_v60  ;;  %v924_v7 = vrot.slane %v911_v61, %v923_v62  ;;  %s4491_s18 = sld [smem:[#allocation23_spill]] }
  0xe3   : > { %1063 = vmatpush1.bf16.msra.mxu0 %v3212_v26  ;;  %2976 = vmatpush3.bf16.msra.mxu1 %v3213_v27 }
  0xe4   : > { %1064 = vmatprep.subr.bf16.mxu0 %v3214_v28  ;;  %2977 = vmatprep.subr.bf16.mxu1 %v3756_v9 }
  0xe7   : > { %1065 = vmatpush1.bf16.msra.mxu0 %v3216_v29  ;;  %2978 = vmatpush3.bf16.msra.mxu1 %v3217_v30  ;;  %p2883_p3 = scmp.ne.s32.totalorder %s4491_s18, 1 }
  0xe8   : > { %1066 = vmatprep.subr.bf16.mxu0 %v3218_v31  ;;  %2979 = vmatprep.subr.bf16.mxu1 %v3756_v9 }
  0xeb   : > { %1067 = vmatpush1.bf16.msra.mxu0 %v3220_v33  ;;  %2980 = vmatpush3.bf16.msra.mxu1 %v3221_v34 }
  0xec   : > { %1068 = vmatprep.subr.bf16.mxu0 %v3222_v35  ;;  %2981 = vmatprep.subr.bf16.mxu1 %v3756_v9 }
  0xef   : > { %1069 = vmatpush1.bf16.msra.mxu0 %v3224_v36  ;;  %2982 = vmatpush3.bf16.msra.mxu1 %v3225_v37 }
  0xf0   : > { %1070 = vmatprep.subr.bf16.mxu0 %v3226_v38  ;;  %2983 = vmatprep.subr.bf16.mxu1 %v3756_v9 }
  0xf3   : > { %1071 = vmatpush1.bf16.msra.mxu0 %v3228_v39  ;;  %2984 = vmatpush3.bf16.msra.mxu1 %v3229_v40 }
  0xf4   : > { %2989 = vmatprep.subr.bf16.mxu1 %v3756_v9  ;;  %3013 = vmatprep.subr.bf16.mxu0 %v3756_v9 }
 0x165   : > { %v840_v11 = vpop.xlane.xlu0 %839 }
 0x166   : > { %v844_v12 = vmul.f32 0.0078125, %v840_v11 }
 0x168   : > { %v4114_v13 = vsub.f32 %v4102_v5, %v844_v12  ;;  %v916_v12 = vrot.slane %v911_v61, %v915_v2 }
 0x169   : > { %v842_v14 = vpop.xlane.xlu0 %841 }
 0x16a   : > { %v845_v15 = vmul.f32 0.0078125, %v842_v14  ;;  %v848_v16 = vmul.f32 %v4114_v13, %v4114_v13 }
 0x16c   : > { %v4119_v17 = vsub.f32 %v4104_v6, %v845_v15  ;;  %850 = vadd.xlane.f32.xlu1 %v848_v16 }
 0x16e   : > { %v849_v18 = vmul.f32 %v4119_v17, %v4119_v17 }
 0x170   : > { %852 = vadd.xlane.f32.xlu1 %v849_v18 }
 0x1f5   : > { %v851_v41 = vpop.xlane.xlu1 %850 }
 0x1f6   : > { %v854_v42 = vmul.f32 0.0078125, %v851_v41 }
 0x1f8   : > { %v856_v43 = vadd.f32 1e-05, %v854_v42 }
 0x1f9   : > { %v853_v44 = vpop.xlane.xlu1 %852 }
 0x1fa   : > { %3318 = vrsqrt.f32 %v856_v43  ;;  %v855_v45 = vmul.f32 0.0078125, %v853_v44 }
 0x1fc   : > { %v857_v46 = vadd.f32 1e-05, %v855_v45 }
 0x1fe   : > { %3320 = vrsqrt.f32 %v857_v46 }
 0x207   : > { %v3319_v47 = vpop.eup %3318 }
 0x208   : > { %v860_v48 = vmul.f32 %v3319_v47, %v4114_v13 }
 0x20a   : > { %v868_v52 = vmul.f32 %v2765_v49, %v860_v48 }
 0x20b   : > { %v3321_v50 = vpop.eup %3320 }
 0x20c   : > { %v861_v51 = vmul.f32 %v3321_v50, %v4119_v17  ;;  %v876_v55 = vadd.f32 %v2766_v53, %v868_v52 }
 0x20e   : > { %v869_v54 = vmul.f32 %v2765_v49, %v861_v51 }
 0x210   : > { %v877_v56 = vadd.f32 %v2766_v53, %v869_v54 }
 0x212   : > { %v878_v57 = vpack.c.bf16 %v877_v56, %v876_v55 }
 0x214   : > { %1089 = vmatmul.mubr.bf16.vlgmr.msra.gmra.mxu0 %v878_v57  ;;  %2986 = vmatmul.mubr.bf16.vlgmr.msra.gmra.mxu1 %v878_v57 }
 0x215   : > { %2991 = vmatprep.mubr.msk.bf16.mxu1 %vm3758_vm0, %v3756_v9  ;;  %3015 = vmatprep.mubr.msk.bf16.mxu0 %vm3758_vm0, %v3756_v9 }
 0x2d4   : > { %v1090_v0 = vpop.f32.mrf.mxu0  ;;  %v1133_v1 = vpop.f32.mrf.mxu1 }
 0x2d5   : > { %v1091_v19 = vadd.f32 %v1090_v0, %v916_v12  ;;  %v1134_v22 = vadd.f32 %v1133_v1, %v924_v7 }
 0x2d6   : > { %v1092_v3 = vpop.f32.mrf.mxu0  ;;  %v2987_v4 = vpop.f32.mrf.mxu1 }
 0x2d7   : > { %v1093_v8 = vadd.f32 %v1092_v3, %v920_v63  ;;  %v1140_v21 = vpack.c.bf16 %v1091_v19, %v1091_v19  ;;  %v4189_v25 = vpack.c.bf16 %v1134_v22, %v1134_v22 }
 0x2d8   : > { %v1094_v10 = vpop.f32.mrf.mxu0  ;;  %v1136_v11 = vpop.f32.mrf.mxu1 }
 0x2d9   : > { %v1142_v13 = vpack.c.bf16 %v1093_v8, %v1093_v8  ;;  %v4180_v14 = vadd.f32 %v1136_v11, %v924_v7  ;;  %v1095_v24 = vadd.f32 %v1094_v10, %v916_v12  ;;  %v1269_v27 = vsel %vm1267_vm2, %v4189_v25, 0 }
 0x2da   : > { %v1096_v15 = vpop.f32.mrf.mxu0  ;;  %v2988_v16 = vpop.f32.mrf.mxu1 }
 0x2db   : > { %v1151_v17 = vsel %vm1146_vm1, %v1142_v13, 0  ;;  %v1097_v18 = vadd.f32 %v1096_v15, %v920_v63  ;;  %v1141_v26 = vpack.c.bf16 %v1095_v24, %v1095_v24  ;;  %v1145_v56 = vpack.c.bf16 %v4180_v14, %v4180_v14 }
 0x2dc   : > { %2990 = vmatpush3.bf16.xpose.msra.mxu1 %v1151_v17 }
 0x2dd   : > { %2995 = vmatprep.subr.bf16.mxu1 %v3756_v9  ;;  %v1143_v20 = vpack.c.bf16 %v1097_v18, %v1097_v18  ;;  %v1315_v61 = vsel %vm1267_vm2, %v1145_v56, 0 }
 0x2df   : > { %v1197_v23 = vsel %vm1146_vm1, %v1143_v20, 0 }
 0x2e3   : > { %2992 = vmatmul.mubr.msk.bf16.vlgmr.msra.gmra.mxu1 %vm1146_vm1, %v1140_v21 }
 0x2e4   : > { %2996 = vmatpush3.bf16.xpose.msra.mxu1 %v1197_v23  ;;  %2997 = vmatprep.mubr.msk.bf16.mxu1 %vm3758_vm0, %v3756_v9 }
 0x2e5   : > { %3001 = vmatprep.subr.bf16.mxu1 %v3756_v9 }
 0x2eb   : > { %2998 = vmatmul.mubr.msk.bf16.vlgmr.msra.gmra.mxu1 %vm1146_vm1, %v1141_v26 }
 0x2ec   : > { %3002 = vmatpush3.bf16.msra.mxu1 %v1269_v27  ;;  %3003 = vmatprep.mubr.msk.bf16.mxu1 %vm3758_vm0, %v3756_v9 }
 0x2ed   : > { %3007 = vmatprep.subr.bf16.mxu1 %v3756_v9 }
 0x3a3   : > { %v1187_v28 = vpop.f32.mrf.mxu1 }
 0x3a4   : > { %v1240_v29 = vsel %vm1239_vm3, %v1187_v28, -inf }
 0x3a5   : > { %1241 = vmax.xlane.f32.xlu0 %v1240_v29  ;;  %v2993_v30 = vpop.f32.mrf.mxu1 }
 0x3a7   : > { %v1190_v31 = vpop.f32.mrf.mxu1 }
 0x3a9   : > { %v2994_v33 = vpop.f32.mrf.mxu1 }
 0x3ab   : > { %v1233_v34 = vpop.f32.mrf.mxu1 }
 0x3ac   : > { %v1243_v35 = vsel %vm1239_vm3, %v1233_v34, -inf }
 0x3ad   : > { %1244 = vmax.xlane.f32.xlu1 %v1243_v35  ;;  %v2999_v36 = vpop.f32.mrf.mxu1 }
 0x3af   : > { %v1236_v37 = vpop.f32.mrf.mxu1 }
 0x3b1   : > { %v3000_v38 = vpop.f32.mrf.mxu1 }
 0x3be   : > { %1413 = vrot.lane.b32.xlu1 %v1143_v20, %s3759_s4 }
 0x42e   : > { %v1242_v39 = vpop.xlane.xlu0 %1241 }
 0x42f   : > { %v1246_v40 = vsub.f32 %v1187_v28, %v1242_v39 }
 0x431   : > { %v1248_v41 = vmul.f32 1.442695, %v1246_v40 }
 0x433   : > { %3322 = vpow2.f32 %v1248_v41 }
 0x436   : > { %v1245_v42 = vpop.xlane.xlu1 %1244 }
 0x437   : > { %v1247_v43 = vsub.f32 %v1233_v34, %v1245_v42 }
 0x439   : > { %v1250_v44 = vmul.f32 1.442695, %v1247_v43 }
 0x43a   : > { %v1414_v50 = vpop.permute.xlu1 %1413 }
 0x43b   : > { %3324 = vpow2.f32 %v1250_v44  ;;  %v1419_v3 = vsel %vm1146_vm1, %v1414_v50, 0  ;;  %v3231_v50 = vld [vmem:[%s4092_s16 + $0x30] sm:$0xff]  }
 0x440   : > { %v3323_v45 = vpop.eup %3322 }
 0x441   : > { %v1252_v46 = vsel %vm1239_vm3, %v3323_v45, 0.0 }
 0x442   : > { %1253 = vadd.xlane.f32.xlu0 %v1252_v46 }
 0x448   : > { %v3325_v47 = vpop.eup %3324 }
 0x449   : > { %v1255_v48 = vsel %vm1239_vm3, %v3325_v47, 0.0 }
 0x44a   : > { %1256 = vadd.xlane.f32.xlu1 %v1255_v48 }
 0x458   : > { %1361 = vrot.lane.b32.xlu0 %v1142_v13, %s3759_s4 }
 0x45b   : > { %1358 = vrot.lane.b32.xlu1 %v1140_v21, %s3759_s4 }
 0x45f   : > { %1410 = vrot.lane.b32.xlu1 %v1141_v26, %s3759_s4 }
 0x4cb   : > { %v1254_v49 = vpop.xlane.xlu0 %1253 }
 0x4cc   : > { %3326 = vrcp.f32 %v1254_v49  ;;  %v3230_v49 = vld [vmem:[%s4092_s16 + $0x38] sm:$0xff]  }
 0x4cf   : > { %v1362_v51 = vpop.permute.xlu0 %1361 }
 0x4d0   : > { %v1367_v52 = vsel %vm1146_vm1, %v1362_v51, 0  ;;  %v3232_v51 = vld [vmem:[%s4092_s16 + $0x28] sm:$0xff]  }
 0x4d1   : > { %3014 = vmatpush3.bf16.xpose.msra.mxu0 %v1367_v52  ;;  %v3233_v52 = vld [vmem:[%s4092_s16 + $0x20] sm:$0xff]  }
 0x4d2   : > { %3025 = vmatprep.subr.bf16.mxu0 %v3756_v9 }
 0x4d3   : > { %v1257_v53 = vpop.xlane.xlu1 %1256 }
 0x4d4   : > { %3328 = vrcp.f32 %v1257_v53  ;;  %v3234_v53 = vld [vmem:[%s4092_s16 + $0x18] sm:$0xff]  }
 0x4d7   : > { %v1359_v54 = vpop.permute.xlu1 %1358 }
 0x4d8   : > { %3016 = vmatmul.mubr.msk.bf16.vlgmr.msra.gmra.mxu0 %vm1146_vm1, %v1359_v54  ;;  %v3235_v54 = vld [vmem:[%s4092_s16 + $0x10] sm:$0xff]  }
 0x4d9   : > { %v3327_v55 = vpop.eup %3326  ;;  %3027 = vmatprep.mubr.msk.bf16.mxu0 %vm3758_vm0, %v3756_v9 }
 0x4da   : > { %v1260_v57 = vmul.f32 %v3327_v55, %v3323_v45  ;;  %v3236_v55 = vld [vmem:[%s4092_s16 + $0x8] sm:$0xff]  }
 0x4db   : > { %v1411_v4 = vpop.permute.xlu1 %1410 }
 0x4dc   : > { %v1262_v58 = vpack.c.bf16 %v1260_v57, %v1260_v57  ;;  %v3237_v57 = vld [vmem:[%s4092_s16] sm:$0xff]  }
 0x4de   : > { %3004 = vmatmul.mubr.msk.bf16.vlgmr.msra.gmra.mxu1 %vm1239_vm3, %v1262_v58 }
 0x4df   : > { %3008 = vmatpush3.bf16.msra.mxu1 %v1315_v61  ;;  %3009 = vmatprep.mubr.msk.bf16.mxu1 %vm3758_vm0, %v3756_v9 }
 0x4e0   : > { %3019 = vmatprep.subr.bf16.mxu1 %v3756_v9 }
 0x4e1   : > { %v3329_v63 = vpop.eup %3328 }
 0x4e2   : > { %v1261_v0 = vmul.f32 %v3329_v63, %v3325_v47 }
 0x4e4   : > { %v1263_v1 = vpack.c.bf16 %v1261_v0, %v1261_v0 }
 0x4e6   : > { %3010 = vmatmul.mubr.msk.bf16.vlgmr.msra.gmra.mxu1 %vm1239_vm3, %v1263_v1 }
 0x4e7   : > { %3020 = vmatpush3.bf16.xpose.msra.mxu1 %v1419_v3  ;;  %3021 = vmatprep.mubr.msk.bf16.mxu1 %vm3758_vm0, %v3756_v9 }
 0x4e8   : > { %3031 = vmatprep.subr.bf16.mxu1 %v3756_v9 }
 0x4ee   : > { %3022 = vmatmul.mubr.msk.bf16.vlgmr.msra.gmra.mxu1 %vm1146_vm1, %v1411_v4 }
 0x4ef   : > { %3033 = vmatprep.mubr.msk.bf16.mxu1 %vm3758_vm0, %v3756_v9 }
 0x598   : > { %v1403_v7 = vpop.f32.mrf.mxu0 }
 0x599   : > { %v1461_v8 = vsel %vm1239_vm3, %v1403_v7, -inf }
 0x59a   : > { %1462 = vmax.xlane.f32.xlu0 %v1461_v8  ;;  %v3017_v10 = vpop.f32.mrf.mxu0 }
 0x59c   : > { %v1406_v11 = vpop.f32.mrf.mxu0 }
 0x59e   : > { %v4226_v12 = vpop.f32.mrf.mxu1  ;;  %v3018_v13 = vpop.f32.mrf.mxu0 }
 0x5a0   : > { %v3005_v14 = vpop.f32.mrf.mxu1 }
 0x5a2   : > { %v1308_v15 = vpop.f32.mrf.mxu1 }
 0x5a3   : > { %v2799_v15 = vld [vmem:[%s688_s5] ss:$0 sm:$0xff] }
 0x5a4   : > { %v3006_v16 = vpop.f32.mrf.mxu1 }
 0x5a6   : > { %v4228_v17 = vpop.f32.mrf.mxu1 }
 0x5a8   : > { %v3011_v18 = vpop.f32.mrf.mxu1 }
 0x5aa   : > { %v1354_v19 = vpop.f32.mrf.mxu1 }
 0x5ac   : > { %v3012_v20 = vpop.f32.mrf.mxu1 }
 0x5ae   : > { %v1455_v21 = vpop.f32.mrf.mxu1 }
 0x5af   : > { %v1464_v22 = vsel %vm1239_vm3, %v1455_v21, -inf }
 0x5b0   : > { %1465 = vmax.xlane.f32.xlu1 %v1464_v22  ;;  %v3023_v23 = vpop.f32.mrf.mxu1 }
 0x5b1   : > { %v3238_v23 = vld [vmem:[%s4097_s8 + $0xe0] ss:$16 sps:$4 sm:$0xff]  }
 0x5b2   : > { %v1458_v24 = vpop.f32.mrf.mxu1 }
 0x5b3   : > { %v3241_v24 = vld [vmem:[%s4097_s8 + $0xe8] ss:$16 sps:$4 sm:$0xff]  }
 0x5b4   : > { %v3024_v26 = vpop.f32.mrf.mxu1 }
 0x5b5   : > { %v3243_v26 = vld [vmem:[%s4097_s8 + $0xec] ss:$16 sps:$4 sm:$0xff]  }
 0x5c1   : > { %1535 = vrot.lane.b32.xlu1 %v1145_v56, %s3759_s4 }
 0x623   : > { %v1463_v27 = vpop.xlane.xlu0 %1462 }
 0x624   : > { %v1467_v28 = vsub.f32 %v1403_v7, %v1463_v27 }
 0x626   : > { %v1469_v29 = vmul.f32 1.442695, %v1467_v28 }
 0x628   : > { %3330 = vpow2.f32 %v1469_v29 }
 0x635   : > { %v3331_v30 = vpop.eup %3330 }
 0x636   : > { %v1473_v31 = vsel %vm1239_vm3, %v3331_v30, 0.0 }
 0x637   : > { %1474 = vadd.xlane.f32.xlu0 %v1473_v31 }
 0x639   : > { %v1466_v33 = vpop.xlane.xlu1 %1465 }
 0x63a   : > { %v1468_v34 = vsub.f32 %v1455_v21, %v1466_v33 }
 0x63c   : > { %v1471_v35 = vmul.f32 1.442695, %v1468_v34  ;;  %v3246_v34 = vld [vmem:[%s4097_s8 + $0xc4] ss:$16 sps:$4 sm:$0xff]  }
 0x63d   : > { %v1536_v36 = vpop.permute.xlu1 %1535 }
 0x63e   : > { %3332 = vpow2.f32 %v1471_v35  ;;  %v1541_v37 = vsel %vm1267_vm2, %v1536_v36, 0  ;;  %v3249_v35 = vld [vmem:[%s4097_s8 + $0xcc] ss:$16 sps:$4 sm:$0xff]   ;;  %v3244_v36 = vld [vmem:[%s4097_s8 + $0xc0] ss:$16 sps:$4 sm:$0xff]  }
 0x63f   : > { %3032 = vmatpush3.bf16.msra.mxu1 %v1541_v37  ;;  %v3247_v37 = vld [vmem:[%s4097_s8 + $0xc8] ss:$16 sps:$4 sm:$0xff]  }
 0x64b   : > { %v3333_v38 = vpop.eup %3332 }
 0x64c   : > { %v1476_v39 = vsel %vm1239_vm3, %v3333_v38, 0.0 }
 0x64d   : > { %1477 = vadd.xlane.f32.xlu0 %v1476_v39  ;;  %v3255_v39 = vld [vmem:[%s4097_s8 + $0xac] ss:$16 sps:$4 sm:$0xff]  }
 0x663   : > { %1486 = vrot.lane.b32.xlu0 %v4189_v25, %s3759_s4 }
 0x6c0   : > { %v1475_v40 = vpop.xlane.xlu0 %1474 }
 0x6c1   : > { %3334 = vrcp.f32 %v1475_v40  ;;  %v3250_v40 = vld [vmem:[%s4097_s8 + $0xa0] ss:$16 sps:$4 sm:$0xff]  }
 0x6ce   : > { %v3335_v41 = vpop.eup %3334 }
 0x6cf   : > { %v1481_v43 = vmul.f32 %v3335_v41, %v3331_v30  ;;  %v3253_v41 = vld [vmem:[%s4097_s8 + $0xa8] ss:$16 sps:$4 sm:$0xff]  }
 0x6d1   : > { %v1483_v46 = vpack.c.bf16 %v1481_v43, %v1481_v43  ;;  %v3258_v43 = vld [vmem:[%s4097_s8 + $0x84] ss:$16 sps:$4 sm:$0xff]  }
 0x6d6   : > { %v1478_v42 = vpop.xlane.xlu0 %1477 }
 0x6d7   : > { %3336 = vrcp.f32 %v1478_v42  ;;  %v3256_v42 = vld [vmem:[%s4097_s8 + $0x80] ss:$16 sps:$4 sm:$0xff]  }
 0x6da   : > { %v1487_v44 = vpop.permute.xlu0 %1486 }
 0x6db   : > { %v1492_v45 = vsel %vm1267_vm2, %v1487_v44, 0  ;;  %v3259_v44 = vld [vmem:[%s4097_s8 + $0x88] ss:$16 sps:$4 sm:$0xff]  }
 0x6dc   : > { %3026 = vmatpush3.bf16.msra.mxu0 %v1492_v45  ;;  %v3261_v45 = vld [vmem:[%s4097_s8 + $0x8c] ss:$16 sps:$4 sm:$0xff]  }
 0x6dd   : > { %3037 = vmatprep.subr.bf16.mxu0 %v3756_v9 }
 0x6df   : > { %3028 = vmatmul.mubr.msk.bf16.vlgmr.msra.gmra.mxu0 %vm1239_vm3, %v1483_v46  ;;  %v3264_v46 = vld [vmem:[%s4097_s8 + $0x64] ss:$16 sps:$4 sm:$0xff]  }
 0x6e0   : > { %3053 = vmatprep.mubr.msk.bf16.mxu0 %vm3758_vm0, %v3756_v9  ;;  %3038 = vmatpush3.bf16.msra.mxu0 %v3230_v49  ;;  %v3270_v49 = vld [vmem:[%s4097_s8 + $0x44] ss:$16 sps:$4 sm:$0xff]  }
 0x6e1   : > { %3039 = vmatprep.subr.bf16.mxu0 %v3756_v9 }
 0x6e4   : > { %v3337_v25 = vpop.eup %3336  ;;  %3040 = vmatpush3.bf16.msra.mxu0 %v3231_v50  ;;  %v3273_v50 = vld [vmem:[%s4097_s8 + $0x4c] ss:$16 sps:$4 sm:$0xff]  }
 0x6e5   : > { %v1482_v47 = vmul.f32 %v3337_v25, %v3333_v38  ;;  %3041 = vmatprep.subr.bf16.mxu0 %v3756_v9  ;;  %v3252_v38 = vld [vmem:[%s4097_s8 + $0xa4] ss:$16 sps:$4 sm:$0xff]   ;;  %v3267_v25 = vld [vmem:[%s4097_s8 + $0x6c] ss:$16 sps:$4 sm:$0xff]  }
 0x6e7   : > { %v1484_v48 = vpack.c.bf16 %v1482_v47, %v1482_v47  ;;  %v3262_v47 = vld [vmem:[%s4097_s8 + $0x60] ss:$16 sps:$4 sm:$0xff]  }
 0x6e8   : > { %3042 = vmatpush3.bf16.msra.mxu0 %v3232_v51  ;;  %v3268_v51 = vld [vmem:[%s4097_s8 + $0x40] ss:$16 sps:$4 sm:$0xff]  }
 0x6e9   : > { %3034 = vmatmul.mubr.msk.bf16.vlgmr.msra.gmra.mxu1 %vm1239_vm3, %v1484_v48  ;;  %3043 = vmatprep.subr.bf16.mxu0 %v3756_v9  ;;  %v3265_v48 = vld [vmem:[%s4097_s8 + $0x68] ss:$16 sps:$4 sm:$0xff]  }
 0x6ea   : > { %1995 = vmatprep.mubr.bf16.mxu1 %v3757_v32 }
 0x6ec   : > { %3044 = vmatpush3.bf16.msra.mxu0 %v3233_v52  ;;  %v3271_v52 = vld [vmem:[%s4097_s8 + $0x48] ss:$16 sps:$4 sm:$0xff]  }
 0x6ed   : > { %3045 = vmatprep.subr.bf16.mxu0 %v3756_v9 }
 0x6f0   : > { %3046 = vmatpush3.bf16.msra.mxu0 %v3234_v53  ;;  %v3276_v53 = vld [vmem:[%s4097_s8 + $0x24] ss:$16 sps:$4 sm:$0xff]  }
 0x6f1   : > { %3047 = vmatprep.subr.bf16.mxu0 %v3756_v9 }
 0x6f4   : > { %3048 = vmatpush3.bf16.msra.mxu0 %v3235_v54  ;;  %v3279_v54 = vld [vmem:[%s4097_s8 + $0x2c] ss:$16 sps:$4 sm:$0xff]  }
 0x6f5   : > { %3049 = vmatprep.subr.bf16.mxu0 %v3756_v9 }
 0x6f8   : > { %3050 = vmatpush3.bf16.msra.mxu0 %v3236_v55  ;;  %v3274_v55 = vld [vmem:[%s4097_s8 + $0x20] ss:$16 sps:$4 sm:$0xff]  }
 0x6f9   : > { %3051 = vmatprep.subr.bf16.mxu0 %v3756_v9 }
 0x6fc   : > { %3052 = vmatpush3.bf16.msra.mxu0 %v3237_v57  ;;  %v3282_v57 = vld [vmem:[%s4097_s8 + $0x4] ss:$16 sps:$4 sm:$0xff]  }
 0x6fd   : > { %2006 = vmatprep.subr.bf16.mxu0 %v3243_v26  ;;  %v3290_v26 = vld [vmem:[%s4099_s20 + $0x70] sm:$0xff]  }
 0x79f   : > { %v1528_v56 = vpop.f32.mrf.mxu0 }
 0x7a1   : > { %v3029_v58 = vpop.f32.mrf.mxu0 }
 0x7a2   : > { %v3285_v58 = vld [vmem:[%s4097_s8 + $0xc] ss:$16 sps:$4 sm:$0xff]  }
 0x7a3   : > { %v1531_v61 = vpop.f32.mrf.mxu0 }
 0x7a4   : > { %v3280_v61 = vld [vmem:[%s4097_s8] ss:$16 sps:$4 sm:$0xff]  }
 0x7a5   : > { %v3030_v63 = vpop.f32.mrf.mxu0 }
 0x7a6   : > { %v3283_v63 = vld [vmem:[%s4097_s8 + $0x8] ss:$16 sps:$4 sm:$0xff]  }
 0x7a9   : > { %v1577_v0 = vpop.f32.mrf.mxu1 }
 0x7aa   : > { %v3193_v1 = vpack.i.bf16 %v1577_v0, %v1528_v56  ;;  %v3277_v56 = vld [vmem:[%s4097_s8 + $0x28] ss:$16 sps:$4 sm:$0xff]  }
 0x7ab   : > { %v3035_v3 = vpop.f32.mrf.mxu1 }
 0x7ac   : > { %3194 = vrot.lane.b32.xlu1 %v3193_v1, %s3759_s4 }
 0x7ad   : > { %v1580_v4 = vpop.f32.mrf.mxu1 }
 0x7af   : > { %v3036_v7 = vpop.f32.mrf.mxu1 }
 0x81e   : > { %v3195_v8 = vpop.permute.xlu1 %3194 }
 0x81f   : > { %v3197_v10 = vunpack.i.h.bf16 %v3195_v8  ;;  %v3196_v11 = vunpack.i.l.bf16 %v3195_v8 }
 0x821   : > { %v1592_v9 = vsel %vm1146_vm1, %v4228_v17, %v3197_v10  ;;  %v1591_v13 = vsel %vm1146_vm1, %v4226_v12, %v3196_v11 }
 0x822   : > { %v1593_v14 = vpack.c.bf16 %v1592_v9, %v1591_v13  ;;  %v2808_v9 = vld [vmem:[%s696_s13] ss:$0 sm:$0xff] }
 0x824   : > { %3054 = vmatmul.mubr.bf16.vlgmr.msra.gmra.mxu0 %v1593_v14 }
 0x825   : > { %2038 = vmatprep.mubr.bf16.mxu0 %v3757_v32  ;;  %v3240_v32 = vld [vmem:[%s4097_s8 + $0xe4] ss:$16 sps:$4 sm:$0xff]   ;;  %2007 = vmatpush1.bf16.msra.mxu0 %v3241_v24  ;;  %v3289_v24 = vld [vmem:[%s4099_s20 + $0xb8] sm:$0xff]  }
 0x826   : > { %1963 = vmatprep.subr.bf16.mxu1 %v3240_v32  ;;  %2008 = vmatprep.subr.bf16.mxu0 %v3249_v35  ;;  %v3288_v32 = vld [vmem:[%s4099_s20 + $0x38] sm:$0xff]   ;;  %v3300_v35 = vld [vmem:[%s4099_s20 + $0x20] sm:$0xff]  }
 0x827   : > { %1964 = vmatpush1.bf16.msra.mxu1 %v3238_v23  ;;  %v3287_v23 = vld [vmem:[%s4099_s20 + $0xf8] sm:$0xff]  }
 0x828   : > { %1965 = vmatprep.subr.bf16.mxu1 %v3246_v34  ;;  %v3299_v34 = vld [vmem:[%s4099_s20 + $0xe0] sm:$0xff]  }
 0x829   : > { %2009 = vmatpush1.bf16.msra.mxu0 %v3247_v37  ;;  %v3302_v37 = vld [vmem:[%s4099_s20 + $0x58] sm:$0xff]  }
 0x82a   : > { %2010 = vmatprep.subr.bf16.mxu0 %v3255_v39  ;;  %v3304_v39 = vld [vmem:[%s4099_s20 + $0x18] sm:$0xff]  }
 0x82b   : > { %1966 = vmatpush1.bf16.msra.mxu1 %v3244_v36  ;;  %v3301_v36 = vld [vmem:[%s4099_s20 + $0xa0] sm:$0xff]  }
 0x82c   : > { %1967 = vmatprep.subr.bf16.mxu1 %v3252_v38  ;;  %v3303_v38 = vld [vmem:[%s4099_s20 + $0xd8] sm:$0xff]  }
 0x82d   : > { %2011 = vmatpush1.bf16.msra.mxu0 %v3253_v41  ;;  %v3306_v41 = vld [vmem:[%s4099_s20 + $0x50] sm:$0xff]  }
 0x82e   : > { %2012 = vmatprep.subr.bf16.mxu0 %v3261_v45  ;;  %v3310_v45 = vld [vmem:[%s4099_s20 + $0x48] sm:$0xff]  }
 0x82f   : > { %1968 = vmatpush1.bf16.msra.mxu1 %v3250_v40  ;;  %v3305_v40 = vld [vmem:[%s4099_s20 + $0x98] sm:$0xff]  }
 0x830   : > { %1969 = vmatprep.subr.bf16.mxu1 %v3258_v43  ;;  %v3308_v43 = vld [vmem:[%s4099_s20 + $0x10] sm:$0xff]  }
 0x831   : > { %2013 = vmatpush1.bf16.msra.mxu0 %v3259_v44  ;;  %v3309_v44 = vld [vmem:[%s4099_s20 + $0x90] sm:$0xff]  }
 0x832   : > { %2014 = vmatprep.subr.bf16.mxu0 %v3267_v25  ;;  %v3312_v25 = vld [vmem:[%s4099_s20 + $0x8] sm:$0xff]  }
 0x833   : > { %1970 = vmatpush1.bf16.msra.mxu1 %v3256_v42  ;;  %v3307_v42 = vld [vmem:[%s4099_s20 + $0xd0] sm:$0xff]  }
 0x834   : > { %1971 = vmatprep.subr.bf16.mxu1 %v3264_v46  ;;  %v3311_v46 = vld [vmem:[%s4099_s20 + $0xc8] sm:$0xff]  }
 0x835   : > { %2015 = vmatpush1.bf16.msra.mxu0 %v3265_v48  ;;  %v3314_v48 = vld [vmem:[%s4099_s20 + $0x40] sm:$0xff]  }
 0x836   : > { %2016 = vmatprep.subr.bf16.mxu0 %v3273_v50  ;;  %v3316_v50 = vld [vmem:[%s4099_s20] sm:$0xff]  }
 0x837   : > { %1972 = vmatpush1.bf16.msra.mxu1 %v3262_v47  ;;  %v3313_v47 = vld [vmem:[%s4099_s20 + $0x88] sm:$0xff]  }
 0x838   : > { %1973 = vmatprep.subr.bf16.mxu1 %v3270_v49  ;;  %v3315_v49 = vld [vmem:[%s4099_s20 + $0xc0] sm:$0xff]  }
 0x839   : > { %2017 = vmatpush1.bf16.msra.mxu0 %v3271_v52  ;;  %v1781_v52 = vld [vmem:[%s4088_s6] sm:$0xf] }
 0x83a   : > { %2018 = vmatprep.subr.bf16.mxu0 %v3279_v54  ;;  %v1786_v54 = vrot.slane %v1781_v52, %v915_v2 }
 0x83b   : > { %1974 = vmatpush1.bf16.msra.mxu1 %v3268_v51  ;;  %v3317_v51 = vld [vmem:[%s4099_s20 + $0x80] sm:$0xff]  }
 0x83c   : > { %1975 = vmatprep.subr.bf16.mxu1 %v3276_v53  ;;  %v1797_v53 = vsub.s32 3, %v4168_v59 }
 0x83d   : > { %2019 = vmatpush1.bf16.msra.mxu0 %v3277_v56  ;;  %v1790_v56 = vrot.slane %v1781_v52, %v919_v60 }
 0x83e   : > { %2020 = vmatprep.subr.bf16.mxu0 %v3285_v58 }
 0x83f   : > { %1976 = vmatpush1.bf16.msra.mxu1 %v3274_v55  ;;  %v1794_v55 = vrot.slane %v1781_v52, %v923_v62 }
 0x840   : > { %1977 = vmatprep.subr.bf16.mxu1 %v3282_v57  ;;  %v1798_v57 = vrot.slane %v1781_v52, %v1797_v53 }
 0x841   : > { %2021 = vmatpush1.bf16.msra.mxu0 %v3283_v63 }
 0x842   : > { %2947 = vmatprep.subr.bf16.mxu0 %v3287_v23 }
 0x843   : > { %1978 = vmatpush1.bf16.msra.mxu1 %v3280_v61 }
 0x8e4   : > { %v1699_v16 = vpop.f32.mrf.mxu0 }
 0x8e5   : > { %v1700_v18 = vadd.f32 %v2799_v15, %v1699_v16  ;;  %v2809_v16 = vld [vmem:[%s704_s7] ss:$0 sm:$0xff] }
 0x8e6   : > { %v3055_v19 = vpop.f32.mrf.mxu0 }
 0x8e7   : > { %v4268_v20 = vadd.f32 %v1700_v18, %v4102_v5 }
 0x8e8   : > { %v1702_v17 = vpop.f32.mrf.mxu0 }
 0x8e9   : > { %v1703_v21 = vadd.f32 %v2799_v15, %v1702_v17  ;;  %1710 = vadd.xlane.f32.xlu1 %v4268_v20 }
 0x8ea   : > { %v3056_v12 = vpop.f32.mrf.mxu0 }
 0x8eb   : > { %v4272_v22 = vadd.f32 %v1703_v21, %v4104_v6  ;;  %v3286_v12 = vld [vmem:[%s4099_s20 + $0x78] sm:$0xff]  }
 0x8ec   : > { %2925 = vmatprep.subr.bf16.mxu1 %v3286_v12 }
 0x8ed   : > { %1712 = vadd.xlane.f32.xlu0 %v4272_v22 }
 0x972   : > { %v1711_v5 = vpop.xlane.xlu1 %1710 }
 0x973   : > { %v1714_v27 = vmul.f32 0.0078125, %v1711_v5  ;;  %v3291_v5 = vld [vmem:[%s4099_s20 + $0xf0] sm:$0xff]  }
 0x975   : > { %v4280_v28 = vsub.f32 %v4268_v20, %v1714_v27  ;;  %v3292_v27 = vld [vmem:[%s4099_s20 + $0x30] sm:$0xff]  }
 0x976   : > { %v1713_v6 = vpop.xlane.xlu0 %1712 }
 0x977   : > { %v1715_v29 = vmul.f32 0.0078125, %v1713_v6  ;;  %v1718_v30 = vmul.f32 %v4280_v28, %v4280_v28  ;;  %v3294_v6 = vld [vmem:[%s4099_s20 + $0x68] sm:$0xff]  }
 0x979   : > { %v4285_v31 = vsub.f32 %v4272_v22, %v1715_v29  ;;  %1720 = vadd.xlane.f32.xlu0 %v1718_v30  ;;  %v3295_v29 = vld [vmem:[%s4099_s20 + $0xe8] sm:$0xff]  }
 0x97a   : > { %v3296_v30 = vld [vmem:[%s4099_s20 + $0x28] sm:$0xff]  }
 0x97b   : > { %v1719_v33 = vmul.f32 %v4285_v31, %v4285_v31 }
 0x97d   : > { %1722 = vadd.xlane.f32.xlu0 %v1719_v33  ;;  %v3298_v33 = vld [vmem:[%s4099_s20 + $0x60] sm:$0xff]  }
 0xa02   : > { %v1721_v0 = vpop.xlane.xlu0 %1720 }
 0xa03   : > { %v1724_v1 = vmul.f32 0.0078125, %v1721_v0 }
 0xa05   : > { %v1726_v3 = vadd.f32 1e-05, %v1724_v1 }
 0xa06   : > { %v1723_v4 = vpop.xlane.xlu0 %1722 }
 0xa07   : > { %3338 = vrsqrt.f32 %v1726_v3  ;;  %v1725_v7 = vmul.f32 0.0078125, %v1723_v4 }
 0xa09   : > { %v1727_v8 = vadd.f32 1e-05, %v1725_v7 }
 0xa0b   : > { %3340 = vrsqrt.f32 %v1727_v8 }
 0xa14   : > { %v3339_v10 = vpop.eup %3338 }
 0xa15   : > { %v1730_v11 = vmul.f32 %v3339_v10, %v4280_v28  ;;  %v3293_v28 = vld [vmem:[%s4099_s20 + $0xb0] sm:$0xff]  }
 0xa17   : > { %v1738_v15 = vmul.f32 %v2808_v9, %v1730_v11 }
 0xa18   : > { %v3341_v13 = vpop.eup %3340 }
 0xa19   : > { %v1731_v14 = vmul.f32 %v3341_v13, %v4285_v31  ;;  %v1746_v19 = vadd.f32 %v2809_v16, %v1738_v15  ;;  %v3297_v31 = vld [vmem:[%s4099_s20 + $0xa8] sm:$0xff]  }
 0xa1b   : > { %v1739_v18 = vmul.f32 %v2808_v9, %v1731_v14 }
 0xa1d   : > { %v1747_v17 = vadd.f32 %v2809_v16, %v1739_v18 }
 0xa1f   : > { %v1748_v21 = vpack.c.bf16 %v1747_v17, %v1746_v19 }
 0xa21   : > { %1996 = vmatmul.mubr.bf16.vlgmr.msra.gmra.mxu1 %v1748_v21  ;;  %2039 = vmatmul.mubr.bf16.vlgmr.msra.gmra.mxu0 %v1748_v21 }
 0xa22   : > { %2926 = vmatpush3.bf16.msra.mxu1 %v3288_v32  ;;  %2948 = vmatpush3.bf16.msra.mxu0 %v3289_v24 }
 0xa23   : > { %2927 = vmatprep.subr.bf16.mxu1 %v3290_v26  ;;  %2949 = vmatprep.subr.bf16.mxu0 %v3291_v5 }
 0xa26   : > { %2928 = vmatpush3.bf16.msra.mxu1 %v3292_v27  ;;  %2950 = vmatpush3.bf16.msra.mxu0 %v3293_v28 }
 0xa27   : > { %2929 = vmatprep.subr.bf16.mxu1 %v3294_v6  ;;  %2951 = vmatprep.subr.bf16.mxu0 %v3295_v29 }
 0xa2a   : > { %2930 = vmatpush3.bf16.msra.mxu1 %v3296_v30  ;;  %2952 = vmatpush3.bf16.msra.mxu0 %v3297_v31 }
 0xa2b   : > { %2931 = vmatprep.subr.bf16.mxu1 %v3298_v33  ;;  %2953 = vmatprep.subr.bf16.mxu0 %v3299_v34 }
 0xa2e   : > { %2932 = vmatpush3.bf16.msra.mxu1 %v3300_v35  ;;  %2954 = vmatpush3.bf16.msra.mxu0 %v3301_v36 }
 0xa2f   : > { %2933 = vmatprep.subr.bf16.mxu1 %v3302_v37  ;;  %2955 = vmatprep.subr.bf16.mxu0 %v3303_v38 }
 0xa32   : > { %2934 = vmatpush3.bf16.msra.mxu1 %v3304_v39  ;;  %2956 = vmatpush3.bf16.msra.mxu0 %v3305_v40 }
 0xa33   : > { %2935 = vmatprep.subr.bf16.mxu1 %v3306_v41  ;;  %2957 = vmatprep.subr.bf16.mxu0 %v3307_v42 }
 0xa36   : > { %2936 = vmatpush3.bf16.msra.mxu1 %v3308_v43  ;;  %2958 = vmatpush3.bf16.msra.mxu0 %v3309_v44 }
 0xa37   : > { %2937 = vmatprep.subr.bf16.mxu1 %v3310_v45  ;;  %2959 = vmatprep.subr.bf16.mxu0 %v3311_v46 }
 0xa3a   : > { %2938 = vmatpush3.bf16.msra.mxu1 %v3312_v25  ;;  %2960 = vmatpush3.bf16.msra.mxu0 %v3313_v47 }
 0xa3b   : > { %2939 = vmatprep.subr.bf16.mxu1 %v3314_v48  ;;  %2961 = vmatprep.subr.bf16.mxu0 %v3315_v49 }
 0xa3e   : > { %2940 = vmatpush3.bf16.msra.mxu1 %v3316_v50  ;;  %2962 = vmatpush3.bf16.msra.mxu0 %v3317_v51 }
 0xae1   : > { %v1997_v58 = vpop.f32.mrf.mxu1  ;;  %v2040_v61 = vpop.f32.mrf.mxu0 }
 0xae2   : > { %v4363_v63 = vadd.f32 %v1997_v58, %v1786_v54  ;;  %v4365_v0 = vadd.f32 %v2040_v61, %v1794_v55 }
 0xae3   : > { %v1999_v1 = vpop.f32.mrf.mxu1  ;;  %v2042_v3 = vpop.f32.mrf.mxu0 }
 0xae4   : > { %v2842_v4 = vmul.f32 -1.702, %v4363_v63  ;;  %v2844_v7 = vmul.f32 -1.702, %v4365_v0  ;;  %v4369_v2 = vadd.f32 %v1999_v1, %v1790_v56  ;;  %v4371_v8 = vadd.f32 %v2042_v3, %v1798_v57 }
 0xae5   : > { %v2001_v62 = vpop.f32.mrf.mxu1  ;;  %v2044_v59 = vpop.f32.mrf.mxu0 }
 0xae6   : > { %v2065_v60 = vmul.f32 1.442695, %v2842_v4  ;;  %v2069_v10 = vmul.f32 1.442695, %v2844_v7  ;;  %v2843_v11 = vmul.f32 -1.702, %v4369_v2  ;;  %v2002_v9 = vadd.f32 %v2001_v62, %v1786_v54 }
 0xae7   : > { %v2845_v13 = vmul.f32 -1.702, %v4371_v8  ;;  %v2045_v14 = vadd.f32 %v2044_v59, %v1794_v55  ;;  %v2003_v15 = vpop.f32.mrf.mxu1  ;;  %v2046_v16 = vpop.f32.mrf.mxu0 }
 0xae8   : > { %3342 = vpow2.f32 %v2065_v60  ;;  %v2067_v18 = vmul.f32 1.442695, %v2843_v11  ;;  %v2846_v19 = vmul.f32 -1.702, %v2002_v9  ;;  %v2004_v17 = vadd.f32 %v2003_v15, %v1790_v56 }
 0xae9   : > { %3344 = vpow2.f32 %v2069_v10  ;;  %v2071_v21 = vmul.f32 1.442695, %v2845_v13  ;;  %v2848_v12 = vmul.f32 -1.702, %v2045_v14  ;;  %v2047_v23 = vadd.f32 %v2046_v16, %v1798_v57 }
 0xaea   : > { %3346 = vpow2.f32 %v2067_v18  ;;  %v2073_v32 = vmul.f32 1.442695, %v2846_v19  ;;  %v2847_v24 = vmul.f32 -1.702, %v2004_v17 }
 0xaeb   : > { %3348 = vpow2.f32 %v2071_v21  ;;  %v2077_v26 = vmul.f32 1.442695, %v2848_v12  ;;  %v2849_v5 = vmul.f32 -1.702, %v2047_v23 }
 0xaec   : > { %3350 = vpow2.f32 %v2073_v32  ;;  %v2075_v27 = vmul.f32 1.442695, %v2847_v24 }
 0xaed   : > { %3352 = vpow2.f32 %v2077_v26  ;;  %v2079_v28 = vmul.f32 1.442695, %v2849_v5 }
 0xaee   : > { %3354 = vpow2.f32 %v2075_v27 }
 0xaef   : > { %3356 = vpow2.f32 %v2079_v28 }
 0xaf5   : > { %v3343_v6 = vpop.eup %3342 }
 0xaf6   : > { %v3345_v29 = vpop.eup %3344  ;;  %v2081_v30 = vadd.f32 1.0, %v3343_v6 }
 0xaf7   : > { %v3347_v31 = vpop.eup %3346  ;;  %v2083_v33 = vadd.f32 1.0, %v3345_v29 }
 0xaf8   : > { %v3349_v34 = vpop.eup %3348  ;;  %3358 = vrcp.f32 %v2081_v30  ;;  %v2082_v35 = vadd.f32 1.0, %v3347_v31 }
 0xaf9   : > { %v3351_v36 = vpop.eup %3350  ;;  %3360 = vrcp.f32 %v2083_v33  ;;  %v2084_v37 = vadd.f32 1.0, %v3349_v34 }
 0xafa   : > { %v3353_v38 = vpop.eup %3352  ;;  %3362 = vrcp.f32 %v2082_v35  ;;  %v2085_v39 = vadd.f32 1.0, %v3351_v36 }
 0xafb   : > { %v3355_v40 = vpop.eup %3354  ;;  %3364 = vrcp.f32 %v2084_v37  ;;  %v2087_v41 = vadd.f32 1.0, %v3353_v38 }
 0xafc   : > { %v3357_v42 = vpop.eup %3356  ;;  %3366 = vrcp.f32 %v2085_v39  ;;  %v2086_v43 = vadd.f32 1.0, %v3355_v40 }
 0xafd   : > { %3368 = vrcp.f32 %v2087_v41  ;;  %v2088_v44 = vadd.f32 1.0, %v3357_v42 }
 0xafe   : > { %3370 = vrcp.f32 %v2086_v43 }
 0xaff   : > { %3372 = vrcp.f32 %v2088_v44 }
 0xb05   : > { %v3359_v45 = vpop.eup %3358 }
 0xb06   : > { %v3361_v46 = vpop.eup %3360  ;;  %v2105_v56 = vmul.f32 %v3359_v45, %v4363_v63  ;;  %v2850_v63 = vld [vmem:[%s821_s29] ss:$0 sm:$0xff] }
 0xb07   : > { %v3363_v25 = vpop.eup %3362  ;;  %v2107_v61 = vmul.f32 %v3361_v46, %v4365_v0 }
 0xb08   : > { %v3365_v47 = vpop.eup %3364  ;;  %v2106_v53 = vmul.f32 %v3363_v25, %v4369_v2 }
 0xb09   : > { %v3367_v48 = vpop.eup %3366  ;;  %v2108_v57 = vmul.f32 %v3365_v47, %v4371_v8 }
 0xb0a   : > { %v3369_v49 = vpop.eup %3368  ;;  %v2109_v51 = vmul.f32 %v3367_v48, %v2002_v9 }
 0xb0b   : > { %v3371_v50 = vpop.eup %3370  ;;  %v2111_v54 = vmul.f32 %v3369_v49, %v2045_v14 }
 0xb0c   : > { %v3373_v52 = vpop.eup %3372  ;;  %v2110_v55 = vmul.f32 %v3371_v50, %v2004_v17  ;;  %v2113_v3 = vpack.c.bf16 %v2109_v51, %v2105_v56 }
 0xb0d   : > { %v2112_v58 = vmul.f32 %v3373_v52, %v2047_v23  ;;  %v2115_v7 = vpack.c.bf16 %v2111_v54, %v2107_v61 }
 0xb0e   : > { %v2114_v1 = vpack.c.bf16 %v2110_v55, %v2106_v53 }
 0xb0f   : > { %v2116_v4 = vpack.c.bf16 %v2112_v58, %v2108_v57 }
 0xb10   : > { %2412 = vmatprep.mubr.bf16.mxu1 %v2114_v1 }
 0xb11   : > { %2453 = vmatprep.mubr.bf16.mxu0 %v2116_v4  ;;  %2413 = vmatmul.mubr.bf16.vlgmr.msra.gmra.mxu1 %v2113_v3 }
 0xb12   : > { %2454 = vmatmul.mubr.bf16.vlgmr.msra.gmra.mxu0 %v2115_v7 }
 0xbd1   : > { %v2941_v62 = vpop.f32.mrf.mxu1 }
 0xbd2   : > { %v2963_v2 = vpop.f32.mrf.mxu0 }
 0xbd3   : > { %v2942_v59 = vpop.f32.mrf.mxu1 }
 0xbd4   : > { %v2943_v8 = vadd.f32 %v2942_v59, %v2941_v62  ;;  %v2964_v60 = vpop.f32.mrf.mxu0 }
 0xbd5   : > { %v2944_v10 = vpop.f32.mrf.mxu1  ;;  %v2965_v11 = vadd.f32 %v2964_v60, %v2963_v2 }
 0xbd6   : > { %v2415_v0 = vadd.f32 %v2943_v8, %v2850_v63  ;;  %v2966_v9 = vpop.f32.mrf.mxu0 }
 0xbd7   : > { %v2945_v13 = vpop.f32.mrf.mxu1 }
 0xbd8   : > { %v2456_v14 = vadd.f32 %v2965_v11, %v2415_v0  ;;  %v2946_v15 = vadd.f32 %v2945_v13, %v2944_v10  ;;  %v2967_v16 = vpop.f32.mrf.mxu0 }
 0xbd9   : > { %v2968_v17 = vadd.f32 %v2967_v16, %v2966_v9 }
 0xbda   : > { %v2462_v18 = vadd.f32 %v2456_v14, %v4268_v20  ;;  %v2418_v19 = vadd.f32 %v2946_v15, %v2850_v63 }
 0xbdc   : > { %2464 = vst [vmem:[#allocation2] sm:$0xff] %v2462_v18  ;;  %v2459_v21 = vadd.f32 %v2968_v17, %v2418_v19  ;;  %2469 = sbr.rel (%p2883_p3) target bundleno = 3049 (0xbe9), region = 124 }
 0xbde   : > { %v2463_v12 = vadd.f32 %v2459_v21, %v4272_v22 }
 0xbe0   : > { %2465 = vst [vmem:[#allocation2 + $0x8] sm:$0xff] %v2463_v12 }
 0xbe3   : > { %v2470_v23 = vld [vmem:[#allocation2] sm:$0xff] }
 0xbe4   : > { %2472 = vst [vmem:[#allocation16] sm:$0xff] %v2470_v23 }
 0xbe7   : > { %v2471_v32 = vld [vmem:[#allocation2 + $0x8] sm:$0xff] }
 0xbe8   : > { %2473 = vst [vmem:[#allocation16 + $0x8] sm:$0xff] %v2471_v32 }
 0xbe9 PF: > { %p3126_p0 = scmp.eq.s32.totalorder %s3867_s19, 1  ;;  %s3760_s23 = smov [#allocation16]  }
 0xbea   : > { %s2483_s13 = sshll.u32 %s3760_s23, 4  ;;  %s2484_s13 = int_to_ptr.vmem [resolvable:$true] %s2483_s13 }
 0xbeb   : > { %s3650_s28 = scalar_lea.vmem %s2484_s13, 256  ;;  %p3657_p5 = scmp.lt.s32.totalorder %s2484_s13, %s2484_s13 }
 0xbec   : > { %p3651_p13 = scmp.ne.s32.totalorder %s2484_s13, %s3650_s28  ;;  %p3658_p11 = scmp.lt.s32.totalorder %s3650_s28, %s3650_s28 }
 0xbee   : > { %p3652_p1 = pnand %p3651_p13, %p3126_p0  ;;  %p3659_p6 = por %p3658_p11, %p3657_p5 }
 0xbf0   : > { %p3653_p2 = pneg %p3652_p1 }
 0xbf2   : > { %p3660_p10 = pnand %p3659_p6, %p3653_p2 }
 0xbf4   : > { %3663 = shalt.err (!%p3660_p10)
}
 0xbf5   : > { %s3761_s15 = smov 128   ;;  %s3762_s11 = smov 8  }
 0xbf6   : > { %s4492_s24 = sld [smem:[#allocation39_spill]] }
 0xbfc   : > { %3086 = dma.vmem_to_hbm [thread:$0]  (%p3126_p0), %s2484_s13, 256, %s4492_s24, [#allocation5], %s3761_s15, %s3761_s15, %s3762_s11  }
 0xbfd   : > { %3711 = dma.done.wait (%p3126_p0), [#allocation5], 256  }
 0xbfe   : > { %3713 = vsyncadd (%p3126_p0), [#allocation5], 4294967040 }
 0xbff PF: > { %s4493_s25 = sld [smem:[#allocation24_spill]]  ;;  %s4498_s16 = smov %s3732_s17 }
 0xc00   : > { %s4494_s29 = sld [smem:[#allocation21_spill]] }
 0xc01   : > { %s4495_s30 = sld [smem:[#allocation22_spill]] }
 0xc02   : > { %s4496_s15 = sld [smem:[#allocation27_spill]] }
 0xc03   : > { %s4497_s26 = sld [smem:[#allocation26_spill]] }
 0xc05   : > { %s27_s18 = sadd.s32 1, %s4493_s25  }
 0xc06   : > { %p24_p8 = scmp.ge.s32.totalorder %s27_s18, 4  }
 0xc08   :  { %26 = sbr.rel (!%p24_p8) target bundleno = 18 (0x12), region = 219 }
 0xc09   : > { %s4499_s17 = smov %s4497_s26 }
 0xc0d   :  { %2499 = vsyncpa [#allocation4], 1 }
 0xc0e   :  { %2501 = vsyncpa [#allocation4 + $0x1], 1 }
 0xc0f   :  { %2502 = vsyncpa [#allocation7], 1 }
 0xc10   :  { %2503 = vsyncpa [#allocation5], 1 }
 0xc11   :  { %2505 = vsyncpa [#allocation5 + $0x1], 1 }

</bundles_post_ra>
